<compile_context>
chip_gen: v6e
topology: v6e:2x2x1
jax: 0.10.0
libtpu: 0.0.40
codegen_flags: <defaults>
</compile_context>

<pallas_src>
import functools

import jax
import jax.numpy as jnp
import numpy as np
from jax import lax
from jax.experimental import pallas as pl
from jax.experimental.pallas import tpu as pltpu

EPS = 1e-5            # nn.BatchNorm2d default eps
_LANE = 128           # TPU lane width

# Centre tap first so the 1x1 projection shortcut can reuse a lane-aligned
# slice (columns [0, round_up(cin,128))) of the shared conv1 im2col LHS.
_TAP_ORDER = ((1, 1), (0, 0), (0, 1), (0, 2), (1, 0), (1, 2), (2, 0), (2, 1),
              (2, 2))


def _round_up(x, m):
  return (x + m - 1) // m * m


def _cdiv(a, b):
  return (a + b - 1) // b


# --------------------------- chip-adaptive sizing ----------------------------

@functools.lru_cache(maxsize=None)
def _vmem_budget_bytes():
  """Scoped-VMEM budget: ~3/4 of physical VMEM, capped at 100 MiB."""
  phys = 64 * 1024 * 1024          # conservative default (v7x-sized)
  try:
    info = pltpu.get_tpu_info()
    cap = getattr(info, "vmem_capacity_bytes", None)
    if cap:
      phys = int(cap)
  except Exception:
    pass
  return int(min(phys * 3 // 4, 100 * 1024 * 1024))


@functools.lru_cache(maxsize=None)
def _buffered1_supported():
  """Probe once whether pipeline_mode=pl.Buffered(1) lowers on this stack."""
  try:
    def _probe(x_ref, o_ref):
      o_ref[...] = x_ref[...] * 2.0

    out = pl.pallas_call(
        _probe,
        grid=(2,),
        in_specs=[pl.BlockSpec((8, 128), lambda i: (0, 0),
                               pipeline_mode=pl.Buffered(1))],
        out_specs=pl.BlockSpec((8, 128), lambda i: (i, 0)),
        out_shape=jax.ShapeDtypeStruct((16, 128), jnp.float32),
    )(jnp.ones((8, 128), jnp.float32))
    jax.block_until_ready(out)
    return True
  except Exception:
    return False


def _resident_spec(shape, index_map):
  """BlockSpec for a grid-invariant operand: single-buffered when supported."""
  if _buffered1_supported():
    return pl.BlockSpec(shape, index_map, pipeline_mode=pl.Buffered(1))
  return pl.BlockSpec(shape, index_map)


def _cparams(n_axes=1):
  return pltpu.CompilerParams(dimension_semantics=("parallel",) * n_axes,
                              vmem_limit_bytes=_vmem_budget_bytes())


def _pick_tm(m, stream_bytes_per_row, resident_bytes):
  """Largest M-tile (multiple of 8) whose double-buffered streams fit the VMEM
  budget, capped so the 'parallel' M axis keeps >= 2 tiles (v7x: 2 TCs)."""
  budget = _vmem_budget_bytes()
  avail = max(budget - resident_bytes - (4 << 20), 4 << 20)
  tm = avail // (2 * max(stream_bytes_per_row, 1))
  tm = max(8, min(1024, (tm // 8) * 8))
  tm = min(tm, max(8, _round_up(_cdiv(m, 2), 8)))
  return int(tm)


# ------------------------------ Pallas kernels --------------------------------

def matmul_stats_kernel(x_ref, w_ref, y_ref, stats_ref):
  """y = x @ w (f32 MXU accumulation) + per-tile column sum / sum-of-squares."""
  acc = jnp.dot(x_ref[...], w_ref[...], preferred_element_type=jnp.float32)
  y_ref[...] = acc.astype(y_ref.dtype)
  stats_ref[...] = jnp.concatenate(
      [jnp.sum(acc, axis=0, keepdims=True),
       jnp.sum(acc * acc, axis=0, keepdims=True)], axis=0)[None]


def matmul_proj_stats_kernel(x_ref, w_ref, ws_ref, y_ref, ysc_ref,
                             stats_ref, statssc_ref, *, kslc):
  """conv1 matmul fused with the 1x1 projection shortcut.

  The shortcut only needs the centre im2col tap, which lives in the first
  `kslc` (lane-aligned) LHS columns, so it is a second small dot instead of a
  full-K zero-padded weight."""
  x = x_ref[...]
  acc = jnp.dot(x, w_ref[...], preferred_element_type=jnp.float32)
  accs = jnp.dot(x[:, :kslc], ws_ref[...], preferred_element_type=jnp.float32)
  y_ref[...] = acc.astype(y_ref.dtype)
  ysc_ref[...] = accs.astype(ysc_ref.dtype)
  stats_ref[...] = jnp.concatenate(
      [jnp.sum(acc, axis=0, keepdims=True),
       jnp.sum(acc * acc, axis=0, keepdims=True)], axis=0)[None]
  statssc_ref[...] = jnp.concatenate(
      [jnp.sum(accs, axis=0, keepdims=True),
       jnp.sum(accs * accs, axis=0, keepdims=True)], axis=0)[None]


def finalize_stats_kernel(stats_ref, g_ref, b_ref, scale_ref, shift_ref,
                          *, inv_m, eps):
  """Reduce per-tile (sum, sumsq) partials ONCE -> per-channel scale/shift."""
  st = jnp.sum(stats_ref[...], axis=0)                # (2, C)
  mean = st[0:1, :] * inv_m
  # TODO(synk): E[y^2]-E[y]^2 can cancel if conv outputs develop a large
  # mean/std ratio; switch to a shifted two-pass variance if that matters.
  var = st[1:2, :] * inv_m - mean * mean
  scale = lax.rsqrt(var + eps) * g_ref[...]
  scale_ref[...] = scale
  shift_ref[...] = b_ref[...] - mean * scale


def scale_shift_relu_kernel(y_ref, s_ref, t_ref, o_ref):
  """relu(y * scale + shift) with pre-finalized per-channel scale/shift."""
  y = y_ref[...].astype(jnp.float32)
  o_ref[...] = jnp.maximum(y * s_ref[...] + t_ref[...], 0.0).astype(o_ref.dtype)


def bn2_add_proj_kernel(y2_ref, s2_ref, t2_ref, ysc_ref, ss_ref, ts_ref, o_ref):
  """relu( relu(bn2(y2)) + bn_sc(ysc) )  (ReLU before the residual add)."""
  main = jnp.maximum(
      y2_ref[...].astype(jnp.float32) * s2_ref[...] + t2_ref[...], 0.0)
  sc = ysc_ref[...].astype(jnp.float32) * ss_ref[...] + ts_ref[...]
  o_ref[...] = jnp.maximum(main + sc, 0.0).astype(o_ref.dtype)


def bn2_add_identity_kernel(y2_ref, s2_ref, t2_ref, x_ref, o_ref):
  """relu( relu(bn2(y2)) + x )  -- dedicated identity-shortcut kernel."""
  main = jnp.maximum(
      y2_ref[...].astype(jnp.float32) * s2_ref[...] + t2_ref[...], 0.0)
  o_ref[...] = jnp.maximum(main + x_ref[...].astype(jnp.float32),
                           0.0).astype(o_ref.dtype)


# ---------------------------- pallas_call wrappers ----------------------------

def _conv_matmul(xp, wp, tm, out_dtype):
  mp, k = xp.shape
  _, cpn = wp.shape
  n_t = mp // tm
  isz = xp.dtype.itemsize
  osz = jnp.dtype(out_dtype).itemsize
  cost = pl.CostEstimate(
      flops=int(2 * mp * k * cpn + 4 * mp * cpn),
      transcendentals=0,
      bytes_accessed=int(mp * k * isz + k * cpn * isz + mp * cpn * osz
                         + n_t * 2 * cpn * 4))
  return pl.pallas_call(
      matmul_stats_kernel,
      grid=(n_t,),
      in_specs=[pl.BlockSpec((tm, k), lambda i: (i, 0)),
                _resident_spec((k, cpn), lambda i: (0, 0))],
      out_specs=[pl.BlockSpec((tm, cpn), lambda i: (i, 0)),
                 pl.BlockSpec((1, 2, cpn), lambda i: (i, 0, 0))],
      out_shape=[jax.ShapeDtypeStruct((mp, cpn), out_dtype),
                 jax.ShapeDtypeStruct((n_t, 2, cpn), jnp.float32)],
      compiler_params=_cparams(),
      cost_estimate=cost,
  )(xp, wp)


def _conv_matmul_proj(xp, wp, wsp, tm, out_dtype):
  mp, k = xp.shape
  _, cpn = wp.shape
  kslc = wsp.shape[0]
  n_t = mp // tm
  isz = xp.dtype.itemsize
  osz = jnp.dtype(out_dtype).itemsize
  kern = functools.partial(matmul_proj_stats_kernel, kslc=kslc)
  cost = pl.CostEstimate(
      flops=int(2 * mp * (k + kslc) * cpn + 8 * mp * cpn),
      transcendentals=0,
      bytes_accessed=int(mp * k * isz + (k + kslc) * cpn * isz
                         + 2 * mp * cpn * osz + n_t * 4 * cpn * 4))
  return pl.pallas_call(
      kern,
      grid=(n_t,),
      in_specs=[pl.BlockSpec((tm, k), lambda i: (i, 0)),
                _resident_spec((k, cpn), lambda i: (0, 0)),
                _resident_spec((kslc, cpn), lambda i: (0, 0))],
      out_specs=[pl.BlockSpec((tm, cpn), lambda i: (i, 0)),
                 pl.BlockSpec((tm, cpn), lambda i: (i, 0)),
                 pl.BlockSpec((1, 2, cpn), lambda i: (i, 0, 0)),
                 pl.BlockSpec((1, 2, cpn), lambda i: (i, 0, 0))],
      out_shape=[jax.ShapeDtypeStruct((mp, cpn), out_dtype),
                 jax.ShapeDtypeStruct((mp, cpn), out_dtype),
                 jax.ShapeDtypeStruct((n_t, 2, cpn), jnp.float32),
                 jax.ShapeDtypeStruct((n_t, 2, cpn), jnp.float32)],
      compiler_params=_cparams(),
      cost_estimate=cost,
  )(xp, wp, wsp)


def _finalize_scale_shift(stats, g, b, m_true):
  n_t, _, cpn = stats.shape
  kern = functools.partial(finalize_stats_kernel, inv_m=1.0 / m_true, eps=EPS)
  cost = pl.CostEstimate(flops=int((2 * n_t + 6) * cpn),
                         transcendentals=int(cpn),
                         bytes_accessed=int((n_t * 2 + 4) * cpn * 4))
  return pl.pallas_call(
      kern,
      grid=(1,),
      in_specs=[pl.BlockSpec((n_t, 2, cpn), lambda i: (0, 0, 0)),
                pl.BlockSpec((1, cpn), lambda i: (0, 0)),
                pl.BlockSpec((1, cpn), lambda i: (0, 0))],
      out_specs=[pl.BlockSpec((1, cpn), lambda i: (0, 0)),
                 pl.BlockSpec((1, cpn), lambda i: (0, 0))],
      out_shape=[jax.ShapeDtypeStruct((1, cpn), jnp.float32),
                 jax.ShapeDtypeStruct((1, cpn), jnp.float32)],
      compiler_params=_cparams(),
      cost_estimate=cost,
  )(stats, g, b)


def _scale_shift_relu(y, s, t, tm, out_dtype):
  mp, cpn = y.shape
  n_t = mp // tm
  osz = jnp.dtype(out_dtype).itemsize
  cost = pl.CostEstimate(
      flops=int(3 * mp * cpn), transcendentals=0,
      bytes_accessed=int(mp * cpn * (y.dtype.itemsize + osz)))
  return pl.pallas_call(
      scale_shift_relu_kernel,
      grid=(n_t,),
      in_specs=[pl.BlockSpec((tm, cpn), lambda i: (i, 0)),
                _resident_spec((1, cpn), lambda i: (0, 0)),
                _resident_spec((1, cpn), lambda i: (0, 0))],
      out_specs=pl.BlockSpec((tm, cpn), lambda i: (i, 0)),
      out_shape=jax.ShapeDtypeStruct((mp, cpn), out_dtype),
      compiler_params=_cparams(),
      cost_estimate=cost,
  )(y, s, t)


def _bn2_add_proj(y2, s2, t2, ysc, ss, ts, tm):
  mp, cpn = y2.shape
  n_t = mp // tm
  cost = pl.CostEstimate(
      flops=int(8 * mp * cpn), transcendentals=0,
      bytes_accessed=int(mp * cpn * (2 * y2.dtype.itemsize + 4)))
  return pl.pallas_call(
      bn2_add_proj_kernel,
      grid=(n_t,),
      in_specs=[pl.BlockSpec((tm, cpn), lambda i: (i, 0)),
                _resident_spec((1, cpn), lambda i: (0, 0)),
                _resident_spec((1, cpn), lambda i: (0, 0)),
                pl.BlockSpec((tm, cpn), lambda i: (i, 0)),
                _resident_spec((1, cpn), lambda i: (0, 0)),
                _resident_spec((1, cpn), lambda i: (0, 0))],
      out_specs=pl.BlockSpec((tm, cpn), lambda i: (i, 0)),
      out_shape=jax.ShapeDtypeStruct((mp, cpn), jnp.float32),
      compiler_params=_cparams(),
      cost_estimate=cost,
  )(y2, s2, t2, ysc, ss, ts)


def _bn2_add_identity(y2, s2, t2, xs, tm):
  mp, cpn = y2.shape
  n_t = mp // tm
  cost = pl.CostEstimate(
      flops=int(5 * mp * cpn), transcendentals=0,
      bytes_accessed=int(mp * cpn * (y2.dtype.itemsize + xs.dtype.itemsize + 4)))
  return pl.pallas_call(
      bn2_add_identity_kernel,
      grid=(n_t,),
      in_specs=[pl.BlockSpec((tm, cpn), lambda i: (i, 0)),
                _resident_spec((1, cpn), lambda i: (0, 0)),
                _resident_spec((1, cpn), lambda i: (0, 0)),
                pl.BlockSpec((tm, cpn), lambda i: (i, 0))],
      out_specs=pl.BlockSpec((tm, cpn), lambda i: (i, 0)),
      out_shape=jax.ShapeDtypeStruct((mp, cpn), jnp.float32),
      compiler_params=_cparams(),
      cost_estimate=cost,
  )(y2, s2, t2, xs)


# -------------------------------- layout glue ---------------------------------

def _im2col_3x3(x_nhwc, stride):
  """3x3, pad=1 patches -> [N*Ho*Wo, 9*C] (static slicing only; _TAP_ORDER)."""
  n, h, w, c = x_nhwc.shape
  ho = (h + 2 - 3) // stride + 1
  wo = (w + 2 - 3) // stride + 1
  xp = jnp.pad(x_nhwc, ((0, 0), (1, 1), (1, 1), (0, 0)))
  taps = []
  for dh, dw in _TAP_ORDER:
    taps.append(xp[:, dh:dh + (ho - 1) * stride + 1:stride,
                   dw:dw + (wo - 1) * stride + 1:stride, :])
  patches = jnp.concatenate(taps, axis=-1)              # [N, Ho, Wo, 9*C]
  return patches.reshape(n * ho * wo, 9 * c), ho, wo


def _w3x3_to_mat(w_oihw, k_pad, c_pad):
  """[Cout, Cin, 3, 3] -> zero-padded [k_pad, c_pad] matching _TAP_ORDER."""
  co, ci, _, _ = w_oihw.shape
  mats = [jnp.transpose(w_oihw[:, :, dh, dw], (1, 0)) for dh, dw in _TAP_ORDER]
  wm = jnp.concatenate(mats, axis=0)                    # (9*ci, co)
  return jnp.pad(wm, ((0, k_pad - 9 * ci), (0, c_pad - co)))


def _pad_vec(v, cpn):
  return jnp.pad(v.reshape(1, -1).astype(jnp.float32),
                 ((0, 0), (0, cpn - v.shape[0])))


# ---------------------------------- forward -----------------------------------

def basic_block_forward(x_nchw, params, stride, compute_dtype=jnp.bfloat16):
  x = jnp.transpose(x_nchw, (0, 2, 3, 1)).astype(jnp.float32)      # NHWC
  n, h, w, cin = x.shape
  cout = params["w1"].shape[0]
  # 256-wide output padding when wide enough to fill a v6e/v7x 256x256 MXU pass.
  cp = _round_up(cout, 256) if cout >= 256 else _round_up(cout, _LANE)
  has_proj = (stride != 1) or (cin != cout)
  in_bytes = jnp.dtype(compute_dtype).itemsize

  # ---- conv1 (3x3 / stride) [+ fused 1x1 projection shortcut] ----------------
  p1, ho, wo = _im2col_3x3(x, stride)                               # [M, 9*cin]
  m = n * ho * wo
  k1p = _round_up(9 * cin, _LANE)
  k2p = _round_up(9 * cout, _LANE)
  kmax = max(k1p, k2p)
  # One shared M-tile, sized from the worst-case (conv) working set.
  stream_row_bytes = kmax * in_bytes + 2 * cp * in_bytes
  resident_bytes = (kmax + _LANE) * cp * in_bytes
  tm = _pick_tm(m, stream_row_bytes, resident_bytes)
  mp = _round_up(m, tm)

  p1p = jnp.pad(p1, ((0, mp - m), (0, k1p - 9 * cin))).astype(compute_dtype)
  w1p = _w3x3_to_mat(params["w1"], k1p, cp).astype(compute_dtype)

  ysc = statssc = None
  if has_proj:
    kslc = _round_up(cin, _LANE)                  # centre tap, lane-aligned
    wsm = jnp.transpose(params["ws"][:, :, 0, 0], (1, 0))           # (cin, cout)
    wsp = jnp.pad(wsm, ((0, kslc - cin), (0, cp - cout))).astype(compute_dtype)
    y1, ysc, stats1, statssc = _conv_matmul_proj(p1p, w1p, wsp, tm,
                                                 compute_dtype)
  else:
    y1, stats1 = _conv_matmul(p1p, w1p, tm, compute_dtype)

  # ---- bn1 + relu (scale/shift finalized ONCE, then purely elementwise) ------
  s1, t1 = _finalize_scale_shift(stats1, _pad_vec(params["g1"], cp),
                                 _pad_vec(params["b1"], cp), m)
  out1 = _scale_shift_relu(y1, s1, t1, tm, compute_dtype)

  # ---- conv2 (3x3, stride 1) --------------------------------------------------
  # TODO(synk): replace this materialized im2col (9x HBM blow-up) with an
  # in-kernel haloed-row-tile tap construction (manual DMA / overlapping
  # blocks) and fold the bn1 scale/shift + relu in as a prologue.
  out1_nhwc = out1[:m, :cout].reshape(n, ho, wo, cout)
  p2, _, _ = _im2col_3x3(out1_nhwc, 1)                              # [M, 9*cout]
  p2p = jnp.pad(p2, ((0, mp - m), (0, k2p - 9 * cout))).astype(compute_dtype)
  w2p = _w3x3_to_mat(params["w2"], k2p, cp).astype(compute_dtype)
  y2, stats2 = _conv_matmul(p2p, w2p, tm, compute_dtype)

  # ---- relu(bn2) + shortcut + relu --------------------------------------------
  s2, t2 = _finalize_scale_shift(stats2, _pad_vec(params["g2"], cp),
                                 _pad_vec(params["b2"], cp), m)
  if has_proj:
    ss, ts = _finalize_scale_shift(statssc, _pad_vec(params["gs"], cp),
                                   _pad_vec(params["bs"], cp), m)
    out = _bn2_add_proj(y2, s2, t2, ysc, ss, ts, tm)
  else:
    xs = jnp.pad(x.reshape(m, cin),
                 ((0, mp - m), (0, cp - cin))).astype(compute_dtype)
    out = _bn2_add_identity(y2, s2, t2, xs, tm)

  out = out[:m, :cout].reshape(n, ho, wo, cout)
  return jnp.transpose(out, (0, 3, 1, 2))                           # NCHW


# ------------------------------ pure-JAX reference -----------------------------

def _ref_basic_block(x, params, stride, conv_dtype=jnp.float32):
  def conv(lhs, w, s, pad):
    return lax.conv_general_dilated(
        lhs.astype(conv_dtype), w.astype(conv_dtype), (s, s),
        [(pad, pad), (pad, pad)],
        dimension_numbers=("NCHW", "OIHW", "NCHW"),
        preferred_element_type=jnp.float32)

  def bn(y, g, b):
    mean = jnp.mean(y, axis=(0, 2, 3), keepdims=True)
    var = jnp.mean(jnp.square(y - mean), axis=(0, 2, 3), keepdims=True)
    return ((y - mean) * lax.rsqrt(var + EPS) * g.reshape(1, -1, 1, 1)
            + b.reshape(1, -1, 1, 1))

  out = jnp.maximum(bn(conv(x, params["w1"], stride, 1),
                       params["g1"], params["b1"]), 0.0)
  out = jnp.maximum(bn(conv(out, params["w2"], 1, 1),
                       params["g2"], params["b2"]), 0.0)
  if "ws" in params:
    sc = bn(conv(x, params["ws"], stride, 0), params["gs"], params["bs"])
  else:
    sc = x
  return jnp.maximum(out + sc, 0.0)


# -------------------------------------- main -----------------------------------

if __name__ == "__main__":
  configs = [
      # (in_channels, out_channels, stride, N, H, W)
      (4, 8, 2, 2, 16, 16),   # projection shortcut (1x1 conv + bn)
      (8, 8, 1, 2, 16, 16),   # identity shortcut
  ]
  for cin, cout, stride, N, H, W in configs:
    key = jax.random.PRNGKey(0)
    ks = jax.random.split(key, 16)
    x = jax.random.normal(ks[0], (N, cin, H, W), jnp.float32)
    params = {
        "w1": 0.1 * jax.random.normal(ks[1], (cout, cin, 3, 3)),
        "g1": 1.0 + 0.1 * jax.random.normal(ks[2], (cout,)),
        "b1": 0.1 * jax.random.normal(ks[3], (cout,)),
        "w2": 0.1 * jax.random.normal(ks[4], (cout, cout, 3, 3)),
        "g2": 1.0 + 0.1 * jax.random.normal(ks[5], (cout,)),
        "b2": 0.1 * jax.random.normal(ks[6], (cout,)),
    }
    if stride != 1 or cin != cout:
      params.update({
          "ws": 0.1 * jax.random.normal(ks[7], (cout, cin, 1, 1)),
          "gs": 1.0 + 0.1 * jax.random.normal(ks[8], (cout,)),
          "bs": 0.1 * jax.random.normal(ks[9], (cout,)),
      })
    params = {k: v.astype(jnp.float32) for k, v in params.items()}

    # f32 MXU path vs f32 reference (tight correctness check).
    fwd_f32 = jax.jit(functools.partial(basic_block_forward, stride=stride,
                                        compute_dtype=jnp.float32))
    out_f32 = jax.block_until_ready(fwd_f32(x, params))
    ref_f32 = jax.block_until_ready(_ref_basic_block(x, params, stride))
    np.testing.assert_allclose(np.asarray(out_f32), np.asarray(ref_f32),
                               rtol=2e-3, atol=2e-3)

    # bf16 fast path (bf16 intermediates) vs a precision-matched reference
    # (bf16 conv inputs, f32 accumulation / BN).
    fwd_bf16 = jax.jit(functools.partial(basic_block_forward, stride=stride,
                                         compute_dtype=jnp.bfloat16))
    out_bf16 = jax.block_until_ready(fwd_bf16(x, params))
    ref_bf16 = jax.block_until_ready(
        _ref_basic_block(x, params, stride, conv_dtype=jnp.bfloat16))
    np.testing.assert_allclose(np.asarray(out_bf16), np.asarray(ref_bf16),
                               rtol=2e-2, atol=2e-2)

  print("KERNEL_OK")
</pallas_src>

<mosaic_0001>
module attributes {stable_mosaic.version = 11 : i64} {
  func.func @matmul_proj_stats_kernel(%arg0: i32, %arg1: memref<64x128xf32, #tpu.memory_space<vmem>>, %arg2: memref<128x128xf32, #tpu.memory_space<vmem>>, %arg3: memref<128x128xf32, #tpu.memory_space<vmem>>, %arg4: memref<64x128xf32, #tpu.memory_space<vmem>>, %arg5: memref<64x128xf32, #tpu.memory_space<vmem>>, %arg6: memref<1x2x128xf32, #tpu.memory_space<vmem>>, %arg7: memref<1x2x128xf32, #tpu.memory_space<vmem>>) attributes {dimension_semantics = [#tpu.dimension_semantics<parallel>], iteration_bounds = array<i64: 2>, scalar_prefetch = 0 : i64, scratch_operands = 0 : i64, tpu.core_type = #tpu.core_type<tc>, window_params = [{transform_indices = @transform_0, window_bounds = array<i64: 64, 128>}, {pipeline_mode = #tpu.pipeline_mode<synchronous>, transform_indices = @transform_1, window_bounds = array<i64: 128, 128>}, {pipeline_mode = #tpu.pipeline_mode<synchronous>, transform_indices = @transform_2, window_bounds = array<i64: 128, 128>}, {transform_indices = @transform_3, window_bounds = array<i64: 64, 128>}, {transform_indices = @transform_4, window_bounds = array<i64: 64, 128>}, {transform_indices = @transform_5, window_bounds = array<i64: 1, 2, 128>}, {transform_indices = @transform_6, window_bounds = array<i64: 1, 2, 128>}]} {
    %c0 = arith.constant 0 : index
    %c0_0 = arith.constant 0 : index
    %0 = vector.load %arg1[%c0, %c0_0] : memref<64x128xf32, #tpu.memory_space<vmem>>, vector<64x128xf32>
    %c0_1 = arith.constant 0 : index
    %c0_2 = arith.constant 0 : index
    %1 = vector.load %arg2[%c0_1, %c0_2] : memref<128x128xf32, #tpu.memory_space<vmem>>, vector<128x128xf32>
    %cst = arith.constant dense<0.000000e+00> : vector<64x128xf32>
    %2 = tpu.matmul %0, %1, %cst {dimension_numbers = #tpu.dot_dimension_numbers<[1], [0], [0], [1], [0, 0, 1, 1], [], []>} : vector<64x128xf32>, vector<128x128xf32>, vector<64x128xf32> -> vector<64x128xf32>
    %c0_3 = arith.constant 0 : index
    %c0_4 = arith.constant 0 : index
    %3 = vector.load %arg3[%c0_3, %c0_4] : memref<128x128xf32, #tpu.memory_space<vmem>>, vector<128x128xf32>
    %cst_5 = arith.constant dense<0.000000e+00> : vector<64x128xf32>
    %4 = tpu.matmul %0, %3, %cst_5 {dimension_numbers = #tpu.dot_dimension_numbers<[1], [0], [0], [1], [0, 0, 1, 1], [], []>} : vector<64x128xf32>, vector<128x128xf32>, vector<64x128xf32> -> vector<64x128xf32>
    %c0_6 = arith.constant 0 : index
    %c0_7 = arith.constant 0 : index
    %5 = vector.load %arg4[%c0_6, %c0_7] : memref<64x128xf32, #tpu.memory_space<vmem>>, vector<64x128xf32>
    tpu.vector_store %arg4[%c0_6, %c0_7], %2 {strides = array<i32>} : memref<64x128xf32, #tpu.memory_space<vmem>>, vector<64x128xf32>,
    %c0_8 = arith.constant 0 : index
    %c0_9 = arith.constant 0 : index
    %6 = vector.load %arg5[%c0_8, %c0_9] : memref<64x128xf32, #tpu.memory_space<vmem>>, vector<64x128xf32>
    tpu.vector_store %arg5[%c0_8, %c0_9], %4 {strides = array<i32>} : memref<64x128xf32, #tpu.memory_space<vmem>>, vector<64x128xf32>,
    %cst_10 = arith.constant dense<0.000000e+00> : vector<128xf32>
    %7 = vector.multi_reduction <add>, %2, %cst_10 [0] : vector<64x128xf32> to vector<128xf32>
    %8 = vector.shape_cast %7 : vector<128xf32> to vector<1x128xf32>
    %9 = arith.mulf %2, %2 : vector<64x128xf32>
    %cst_11 = arith.constant dense<0.000000e+00> : vector<128xf32>
    %10 = vector.multi_reduction <add>, %9, %cst_11 [0] : vector<64x128xf32> to vector<128xf32>
    %11 = vector.shape_cast %10 : vector<128xf32> to vector<1x128xf32>
    %12 = tpu.concatenate %8, %11 in 0 : vector<1x128xf32>, vector<1x128xf32> -> vector<2x128xf32>
    %13 = vector.shape_cast %12 : vector<2x128xf32> to vector<1x2x128xf32>
    %c0_12 = arith.constant 0 : index
    %c0_13 = arith.constant 0 : index
    %c0_14 = arith.constant 0 : index
    %14 = vector.load %arg6[%c0_12, %c0_13, %c0_14] : memref<1x2x128xf32, #tpu.memory_space<vmem>>, vector<1x2x128xf32>
    tpu.vector_store %arg6[%c0_12, %c0_13, %c0_14], %13 {strides = array<i32>} : memref<1x2x128xf32, #tpu.memory_space<vmem>>, vector<1x2x128xf32>,
    %cst_15 = arith.constant dense<0.000000e+00> : vector<128xf32>
    %15 = vector.multi_reduction <add>, %4, %cst_15 [0] : vector<64x128xf32> to vector<128xf32>
    %16 = vector.shape_cast %15 : vector<128xf32> to vector<1x128xf32>
    %17 = arith.mulf %4, %4 : vector<64x128xf32>
    %cst_16 = arith.constant dense<0.000000e+00> : vector<128xf32>
    %18 = vector.multi_reduction <add>, %17, %cst_16 [0] : vector<64x128xf32> to vector<128xf32>
    %19 = vector.shape_cast %18 : vector<128xf32> to vector<1x128xf32>
    %20 = tpu.concatenate %16, %19 in 0 : vector<1x128xf32>, vector<1x128xf32> -> vector<2x128xf32>
    %21 = vector.shape_cast %20 : vector<2x128xf32> to vector<1x2x128xf32>
    %c0_17 = arith.constant 0 : index
    %c0_18 = arith.constant 0 : index
    %c0_19 = arith.constant 0 : index
    %22 = vector.load %arg7[%c0_17, %c0_18, %c0_19] : memref<1x2x128xf32, #tpu.memory_space<vmem>>, vector<1x2x128xf32>
    tpu.vector_store %arg7[%c0_17, %c0_18, %c0_19], %21 {strides = array<i32>} : memref<1x2x128xf32, #tpu.memory_space<vmem>>, vector<1x2x128xf32>,
    return
  }
  func.func @transform_0(%arg0: i32) -> (i32, i32) {
    %c0_i32 = arith.constant 0 : i32
    %c0_i32_0 = arith.constant 0 : i32
    return %arg0, %c0_i32 : i32, i32
  }
  func.func @transform_1(%arg0: i32) -> (i32, i32) {
    %c0_i32 = arith.constant 0 : i32
    %c0_i32_0 = arith.constant 0 : i32
    %c0_i32_1 = arith.constant 0 : i32
    return %c0_i32, %c0_i32_0 : i32, i32
  }
  func.func @transform_2(%arg0: i32) -> (i32, i32) {
    %c0_i32 = arith.constant 0 : i32
    %c0_i32_0 = arith.constant 0 : i32
    %c0_i32_1 = arith.constant 0 : i32
    return %c0_i32, %c0_i32_0 : i32, i32
  }
  func.func @transform_3(%arg0: i32) -> (i32, i32) {
    %c0_i32 = arith.constant 0 : i32
    %c0_i32_0 = arith.constant 0 : i32
    return %arg0, %c0_i32 : i32, i32
  }
  func.func @transform_4(%arg0: i32) -> (i32, i32) {
    %c0_i32 = arith.constant 0 : i32
    %c0_i32_0 = arith.constant 0 : i32
    return %arg0, %c0_i32 : i32, i32
  }
  func.func @transform_5(%arg0: i32) -> (i32, i32, i32) {
    %c0_i32 = arith.constant 0 : i32
    %c0_i32_0 = arith.constant 0 : i32
    %c0_i32_1 = arith.constant 0 : i32
    return %arg0, %c0_i32, %c0_i32_0 : i32, i32, i32
  }
  func.func @transform_6(%arg0: i32) -> (i32, i32, i32) {
    %c0_i32 = arith.constant 0 : i32
    %c0_i32_0 = arith.constant 0 : i32
    %c0_i32_1 = arith.constant 0 : i32
    return %arg0, %c0_i32, %c0_i32_0 : i32, i32, i32
  }
}

module attributes {stable_mosaic.version = 11 : i64} {
  func.func @scale_shift_relu_kernel(%arg0: i32, %arg1: memref<64x128xf32, #tpu.memory_space<vmem>>, %arg2: memref<1x128xf32, #tpu.memory_space<vmem>>, %arg3: memref<1x128xf32, #tpu.memory_space<vmem>>, %arg4: memref<64x128xf32, #tpu.memory_space<vmem>>) attributes {dimension_semantics = [#tpu.dimension_semantics<parallel>], iteration_bounds = array<i64: 2>, scalar_prefetch = 0 : i64, scratch_operands = 0 : i64, tpu.core_type = #tpu.core_type<tc>, window_params = [{transform_indices = @transform_0, window_bounds = array<i64: 64, 128>}, {pipeline_mode = #tpu.pipeline_mode<synchronous>, transform_indices = @transform_1, window_bounds = array<i64: 1, 128>}, {pipeline_mode = #tpu.pipeline_mode<synchronous>, transform_indices = @transform_2, window_bounds = array<i64: 1, 128>}, {transform_indices = @transform_3, window_bounds = array<i64: 64, 128>}]} {
    %c0 = arith.constant 0 : index
    %c0_0 = arith.constant 0 : index
    %0 = vector.load %arg1[%c0, %c0_0] : memref<64x128xf32, #tpu.memory_space<vmem>>, vector<64x128xf32>
    %c0_1 = arith.constant 0 : index
    %c0_2 = arith.constant 0 : index
    %1 = vector.load %arg2[%c0_1, %c0_2] : memref<1x128xf32, #tpu.memory_space<vmem>>, vector<1x128xf32>
    %2 = vector.broadcast %1 : vector<1x128xf32> to vector<64x128xf32>
    %3 = arith.mulf %0, %2 : vector<64x128xf32>
    %c0_3 = arith.constant 0 : index
    %c0_4 = arith.constant 0 : index
    %4 = vector.load %arg3[%c0_3, %c0_4] : memref<1x128xf32, #tpu.memory_space<vmem>>, vector<1x128xf32>
    %5 = vector.broadcast %4 : vector<1x128xf32> to vector<64x128xf32>
    %6 = arith.addf %3, %5 : vector<64x128xf32>
    %cst = arith.constant 0.000000e+00 : f32
    %7 = vector.broadcast %cst : f32 to vector<64x128xf32>
    %8 = arith.maximumf %6, %7 : vector<64x128xf32>
    %c0_5 = arith.constant 0 : index
    %c0_6 = arith.constant 0 : index
    %9 = vector.load %arg4[%c0_5, %c0_6] : memref<64x128xf32, #tpu.memory_space<vmem>>, vector<64x128xf32>
    tpu.vector_store %arg4[%c0_5, %c0_6], %8 {strides = array<i32>} : memref<64x128xf32, #tpu.memory_space<vmem>>, vector<64x128xf32>,
    return
  }
  func.func @transform_0(%arg0: i32) -> (i32, i32) {
    %c0_i32 = arith.constant 0 : i32
    %c0_i32_0 = arith.constant 0 : i32
    return %arg0, %c0_i32 : i32, i32
  }
  func.func @transform_1(%arg0: i32) -> (i32, i32) {
    %c0_i32 = arith.constant 0 : i32
    %c0_i32_0 = arith.constant 0 : i32
    %c0_i32_1 = arith.constant 0 : i32
    return %c0_i32, %c0_i32_0 : i32, i32
  }
  func.func @transform_2(%arg0: i32) -> (i32, i32) {
    %c0_i32 = arith.constant 0 : i32
    %c0_i32_0 = arith.constant 0 : i32
    %c0_i32_1 = arith.constant 0 : i32
    return %c0_i32, %c0_i32_0 : i32, i32
  }
  func.func @transform_3(%arg0: i32) -> (i32, i32) {
    %c0_i32 = arith.constant 0 : i32
    %c0_i32_0 = arith.constant 0 : i32
    return %arg0, %c0_i32 : i32, i32
  }
}

module attributes {stable_mosaic.version = 11 : i64} {
  func.func @finalize_stats_kernel(%arg0: i32, %arg1: memref<2x2x128xf32, #tpu.memory_space<vmem>>, %arg2: memref<1x128xf32, #tpu.memory_space<vmem>>, %arg3: memref<1x128xf32, #tpu.memory_space<vmem>>, %arg4: memref<1x128xf32, #tpu.memory_space<vmem>>, %arg5: memref<1x128xf32, #tpu.memory_space<vmem>>) attributes {dimension_semantics = [#tpu.dimension_semantics<parallel>], iteration_bounds = array<i64: 1>, scalar_prefetch = 0 : i64, scratch_operands = 0 : i64, tpu.core_type = #tpu.core_type<tc>, window_params = [{pipeline_mode = #tpu.pipeline_mode<synchronous>, transform_indices = @transform_0, window_bounds = array<i64: 2, 2, 128>}, {pipeline_mode = #tpu.pipeline_mode<synchronous>, transform_indices = @transform_1, window_bounds = array<i64: 1, 128>}, {pipeline_mode = #tpu.pipeline_mode<synchronous>, transform_indices = @transform_2, window_bounds = array<i64: 1, 128>}, {pipeline_mode = #tpu.pipeline_mode<synchronous>, transform_indices = @transform_3, window_bounds = array<i64: 1, 128>}, {pipeline_mode = #tpu.pipeline_mode<synchronous>, transform_indices = @transform_4, window_bounds = array<i64: 1, 128>}]} {
    %c0 = arith.constant 0 : index
    %c0_0 = arith.constant 0 : index
    %c0_1 = arith.constant 0 : index
    %0 = vector.load %arg1[%c0, %c0_0, %c0_1] : memref<2x2x128xf32, #tpu.memory_space<vmem>>, vector<2x2x128xf32>
    %cst = arith.constant dense<0.000000e+00> : vector<2x128xf32>
    %1 = vector.multi_reduction <add>, %0, %cst [0] : vector<2x2x128xf32> to vector<2x128xf32>
    %2 = vector.extract_strided_slice %1 {offsets = [0, 0], sizes = [1, 128], strides = [1, 1]} : vector<2x128xf32> to vector<1x128xf32>
    %cst_2 = arith.constant 7.812500e-03 : f32
    %3 = vector.broadcast %cst_2 : f32 to vector<1x128xf32>
    %4 = arith.mulf %2, %3 : vector<1x128xf32>
    %5 = vector.extract_strided_slice %1 {offsets = [1, 0], sizes = [1, 128], strides = [1, 1]} : vector<2x128xf32> to vector<1x128xf32>
    %cst_3 = arith.constant 7.812500e-03 : f32
    %6 = vector.broadcast %cst_3 : f32 to vector<1x128xf32>
    %7 = arith.mulf %5, %6 : vector<1x128xf32>
    %8 = arith.mulf %4, %4 : vector<1x128xf32>
    %9 = arith.subf %7, %8 : vector<1x128xf32>
    %cst_4 = arith.constant 9.99999974E-6 : f32
    %10 = vector.broadcast %cst_4 : f32 to vector<1x128xf32>
    %11 = arith.addf %9, %10 : vector<1x128xf32>
    %12 = math.rsqrt %11 : vector<1x128xf32>
    %c0_5 = arith.constant 0 : index
    %c0_6 = arith.constant 0 : index
    %13 = vector.load %arg2[%c0_5, %c0_6] : memref<1x128xf32, #tpu.memory_space<vmem>>, vector<1x128xf32>
    %14 = arith.mulf %12, %13 : vector<1x128xf32>
    %c0_7 = arith.constant 0 : index
    %c0_8 = arith.constant 0 : index
    %15 = vector.load %arg4[%c0_7, %c0_8] : memref<1x128xf32, #tpu.memory_space<vmem>>, vector<1x128xf32>
    tpu.vector_store %arg4[%c0_7, %c0_8], %14 {strides = array<i32>} : memref<1x128xf32, #tpu.memory_space<vmem>>, vector<1x128xf32>,
    %c0_9 = arith.constant 0 : index
    %c0_10 = arith.constant 0 : index
    %16 = vector.load %arg3[%c0_9, %c0_10] : memref<1x128xf32, #tpu.memory_space<vmem>>, vector<1x128xf32>
    %17 = arith.mulf %4, %14 : vector<1x128xf32>
    %18 = arith.subf %16, %17 : vector<1x128xf32>
    %c0_11 = arith.constant 0 : index
    %c0_12 = arith.constant 0 : index
    %19 = vector.load %arg5[%c0_11, %c0_12] : memref<1x128xf32, #tpu.memory_space<vmem>>, vector<1x128xf32>
    tpu.vector_store %arg5[%c0_11, %c0_12], %18 {strides = array<i32>} : memref<1x128xf32, #tpu.memory_space<vmem>>, vector<1x128xf32>,
    return
  }
  func.func @transform_0(%arg0: i32) -> (i32, i32, i32) {
    %c0_i32 = arith.constant 0 : i32
    %c0_i32_0 = arith.constant 0 : i32
    %c0_i32_1 = arith.constant 0 : i32
    %c0_i32_2 = arith.constant 0 : i32
    return %c0_i32, %c0_i32_0, %c0_i32_1 : i32, i32, i32
  }
  func.func @transform_1(%arg0: i32) -> (i32, i32) {
    %c0_i32 = arith.constant 0 : i32
    %c0_i32_0 = arith.constant 0 : i32
    %c0_i32_1 = arith.constant 0 : i32
    return %c0_i32, %c0_i32_0 : i32, i32
  }
  func.func @transform_2(%arg0: i32) -> (i32, i32) {
    %c0_i32 = arith.constant 0 : i32
    %c0_i32_0 = arith.constant 0 : i32
    %c0_i32_1 = arith.constant 0 : i32
    return %c0_i32, %c0_i32_0 : i32, i32
  }
  func.func @transform_3(%arg0: i32) -> (i32, i32) {
    %c0_i32 = arith.constant 0 : i32
    %c0_i32_0 = arith.constant 0 : i32
    %c0_i32_1 = arith.constant 0 : i32
    return %c0_i32, %c0_i32_0 : i32, i32
  }
  func.func @transform_4(%arg0: i32) -> (i32, i32) {
    %c0_i32 = arith.constant 0 : i32
    %c0_i32_0 = arith.constant 0 : i32
    %c0_i32_1 = arith.constant 0 : i32
    return %c0_i32, %c0_i32_0 : i32, i32
  }
}

module attributes {stable_mosaic.version = 11 : i64} {
  func.func @matmul_stats_kernel(%arg0: i32, %arg1: memref<64x128xf32, #tpu.memory_space<vmem>>, %arg2: memref<128x128xf32, #tpu.memory_space<vmem>>, %arg3: memref<64x128xf32, #tpu.memory_space<vmem>>, %arg4: memref<1x2x128xf32, #tpu.memory_space<vmem>>) attributes {dimension_semantics = [#tpu.dimension_semantics<parallel>], iteration_bounds = array<i64: 2>, scalar_prefetch = 0 : i64, scratch_operands = 0 : i64, tpu.core_type = #tpu.core_type<tc>, window_params = [{transform_indices = @transform_0, window_bounds = array<i64: 64, 128>}, {pipeline_mode = #tpu.pipeline_mode<synchronous>, transform_indices = @transform_1, window_bounds = array<i64: 128, 128>}, {transform_indices = @transform_2, window_bounds = array<i64: 64, 128>}, {transform_indices = @transform_3, window_bounds = array<i64: 1, 2, 128>}]} {
    %c0 = arith.constant 0 : index
    %c0_0 = arith.constant 0 : index
    %0 = vector.load %arg1[%c0, %c0_0] : memref<64x128xf32, #tpu.memory_space<vmem>>, vector<64x128xf32>
    %c0_1 = arith.constant 0 : index
    %c0_2 = arith.constant 0 : index
    %1 = vector.load %arg2[%c0_1, %c0_2] : memref<128x128xf32, #tpu.memory_space<vmem>>, vector<128x128xf32>
    %cst = arith.constant dense<0.000000e+00> : vector<64x128xf32>
    %2 = tpu.matmul %0, %1, %cst {dimension_numbers = #tpu.dot_dimension_numbers<[1], [0], [0], [1], [0, 0, 1, 1], [], []>} : vector<64x128xf32>, vector<128x128xf32>, vector<64x128xf32> -> vector<64x128xf32>
    %c0_3 = arith.constant 0 : index
    %c0_4 = arith.constant 0 : index
    %3 = vector.load %arg3[%c0_3, %c0_4] : memref<64x128xf32, #tpu.memory_space<vmem>>, vector<64x128xf32>
    tpu.vector_store %arg3[%c0_3, %c0_4], %2 {strides = array<i32>} : memref<64x128xf32, #tpu.memory_space<vmem>>, vector<64x128xf32>,
    %cst_5 = arith.constant dense<0.000000e+00> : vector<128xf32>
    %4 = vector.multi_reduction <add>, %2, %cst_5 [0] : vector<64x128xf32> to vector<128xf32>
    %5 = vector.shape_cast %4 : vector<128xf32> to vector<1x128xf32>
    %6 = arith.mulf %2, %2 : vector<64x128xf32>
    %cst_6 = arith.constant dense<0.000000e+00> : vector<128xf32>
    %7 = vector.multi_reduction <add>, %6, %cst_6 [0] : vector<64x128xf32> to vector<128xf32>
    %8 = vector.shape_cast %7 : vector<128xf32> to vector<1x128xf32>
    %9 = tpu.concatenate %5, %8 in 0 : vector<1x128xf32>, vector<1x128xf32> -> vector<2x128xf32>
    %10 = vector.shape_cast %9 : vector<2x128xf32> to vector<1x2x128xf32>
    %c0_7 = arith.constant 0 : index
    %c0_8 = arith.constant 0 : index
    %c0_9 = arith.constant 0 : index
    %11 = vector.load %arg4[%c0_7, %c0_8, %c0_9] : memref<1x2x128xf32, #tpu.memory_space<vmem>>, vector<1x2x128xf32>
    tpu.vector_store %arg4[%c0_7, %c0_8, %c0_9], %10 {strides = array<i32>} : memref<1x2x128xf32, #tpu.memory_space<vmem>>, vector<1x2x128xf32>,
    return
  }
  func.func @transform_0(%arg0: i32) -> (i32, i32) {
    %c0_i32 = arith.constant 0 : i32
    %c0_i32_0 = arith.constant 0 : i32
    return %arg0, %c0_i32 : i32, i32
  }
  func.func @transform_1(%arg0: i32) -> (i32, i32) {
    %c0_i32 = arith.constant 0 : i32
    %c0_i32_0 = arith.constant 0 : i32
    %c0_i32_1 = arith.constant 0 : i32
    return %c0_i32, %c0_i32_0 : i32, i32
  }
  func.func @transform_2(%arg0: i32) -> (i32, i32) {
    %c0_i32 = arith.constant 0 : i32
    %c0_i32_0 = arith.constant 0 : i32
    return %arg0, %c0_i32 : i32, i32
  }
  func.func @transform_3(%arg0: i32) -> (i32, i32, i32) {
    %c0_i32 = arith.constant 0 : i32
    %c0_i32_0 = arith.constant 0 : i32
    %c0_i32_1 = arith.constant 0 : i32
    return %arg0, %c0_i32, %c0_i32_0 : i32, i32, i32
  }
}

module attributes {stable_mosaic.version = 11 : i64} {
  func.func @bn2_add_proj_kernel(%arg0: i32, %arg1: memref<64x128xf32, #tpu.memory_space<vmem>>, %arg2: memref<1x128xf32, #tpu.memory_space<vmem>>, %arg3: memref<1x128xf32, #tpu.memory_space<vmem>>, %arg4: memref<64x128xf32, #tpu.memory_space<vmem>>, %arg5: memref<1x128xf32, #tpu.memory_space<vmem>>, %arg6: memref<1x128xf32, #tpu.memory_space<vmem>>, %arg7: memref<64x128xf32, #tpu.memory_space<vmem>>) attributes {dimension_semantics = [#tpu.dimension_semantics<parallel>], iteration_bounds = array<i64: 2>, scalar_prefetch = 0 : i64, scratch_operands = 0 : i64, tpu.core_type = #tpu.core_type<tc>, window_params = [{transform_indices = @transform_0, window_bounds = array<i64: 64, 128>}, {pipeline_mode = #tpu.pipeline_mode<synchronous>, transform_indices = @transform_1, window_bounds = array<i64: 1, 128>}, {pipeline_mode = #tpu.pipeline_mode<synchronous>, transform_indices = @transform_2, window_bounds = array<i64: 1, 128>}, {transform_indices = @transform_3, window_bounds = array<i64: 64, 128>}, {pipeline_mode = #tpu.pipeline_mode<synchronous>, transform_indices = @transform_4, window_bounds = array<i64: 1, 128>}, {pipeline_mode = #tpu.pipeline_mode<synchronous>, transform_indices = @transform_5, window_bounds = array<i64: 1, 128>}, {transform_indices = @transform_6, window_bounds = array<i64: 64, 128>}]} {
    %c0 = arith.constant 0 : index
    %c0_0 = arith.constant 0 : index
    %0 = vector.load %arg1[%c0, %c0_0] : memref<64x128xf32, #tpu.memory_space<vmem>>, vector<64x128xf32>
    %c0_1 = arith.constant 0 : index
    %c0_2 = arith.constant 0 : index
    %1 = vector.load %arg2[%c0_1, %c0_2] : memref<1x128xf32, #tpu.memory_space<vmem>>, vector<1x128xf32>
    %2 = vector.broadcast %1 : vector<1x128xf32> to vector<64x128xf32>
    %3 = arith.mulf %0, %2 : vector<64x128xf32>
    %c0_3 = arith.constant 0 : index
    %c0_4 = arith.constant 0 : index
    %4 = vector.load %arg3[%c0_3, %c0_4] : memref<1x128xf32, #tpu.memory_space<vmem>>, vector<1x128xf32>
    %5 = vector.broadcast %4 : vector<1x128xf32> to vector<64x128xf32>
    %6 = arith.addf %3, %5 : vector<64x128xf32>
    %cst = arith.constant 0.000000e+00 : f32
    %7 = vector.broadcast %cst : f32 to vector<64x128xf32>
    %8 = arith.maximumf %6, %7 : vector<64x128xf32>
    %c0_5 = arith.constant 0 : index
    %c0_6 = arith.constant 0 : index
    %9 = vector.load %arg4[%c0_5, %c0_6] : memref<64x128xf32, #tpu.memory_space<vmem>>, vector<64x128xf32>
    %c0_7 = arith.constant 0 : index
    %c0_8 = arith.constant 0 : index
    %10 = vector.load %arg5[%c0_7, %c0_8] : memref<1x128xf32, #tpu.memory_space<vmem>>, vector<1x128xf32>
    %11 = vector.broadcast %10 : vector<1x128xf32> to vector<64x128xf32>
    %12 = arith.mulf %9, %11 : vector<64x128xf32>
    %c0_9 = arith.constant 0 : index
    %c0_10 = arith.constant 0 : index
    %13 = vector.load %arg6[%c0_9, %c0_10] : memref<1x128xf32, #tpu.memory_space<vmem>>, vector<1x128xf32>
    %14 = vector.broadcast %13 : vector<1x128xf32> to vector<64x128xf32>
    %15 = arith.addf %12, %14 : vector<64x128xf32>
    %16 = arith.addf %8, %15 : vector<64x128xf32>
    %cst_11 = arith.constant 0.000000e+00 : f32
    %17 = vector.broadcast %cst_11 : f32 to vector<64x128xf32>
    %18 = arith.maximumf %16, %17 : vector<64x128xf32>
    %c0_12 = arith.constant 0 : index
    %c0_13 = arith.constant 0 : index
    %19 = vector.load %arg7[%c0_12, %c0_13] : memref<64x128xf32, #tpu.memory_space<vmem>>, vector<64x128xf32>
    tpu.vector_store %arg7[%c0_12, %c0_13], %18 {strides = array<i32>} : memref<64x128xf32, #tpu.memory_space<vmem>>, vector<64x128xf32>,
    return
  }
  func.func @transform_0(%arg0: i32) -> (i32, i32) {
    %c0_i32 = arith.constant 0 : i32
    %c0_i32_0 = arith.constant 0 : i32
    return %arg0, %c0_i32 : i32, i32
  }
  func.func @transform_1(%arg0: i32) -> (i32, i32) {
    %c0_i32 = arith.constant 0 : i32
    %c0_i32_0 = arith.constant 0 : i32
    %c0_i32_1 = arith.constant 0 : i32
    return %c0_i32, %c0_i32_0 : i32, i32
  }
  func.func @transform_2(%arg0: i32) -> (i32, i32) {
    %c0_i32 = arith.constant 0 : i32
    %c0_i32_0 = arith.constant 0 : i32
    %c0_i32_1 = arith.constant 0 : i32
    return %c0_i32, %c0_i32_0 : i32, i32
  }
  func.func @transform_3(%arg0: i32) -> (i32, i32) {
    %c0_i32 = arith.constant 0 : i32
    %c0_i32_0 = arith.constant 0 : i32
    return %arg0, %c0_i32 : i32, i32
  }
  func.func @transform_4(%arg0: i32) -> (i32, i32) {
    %c0_i32 = arith.constant 0 : i32
    %c0_i32_0 = arith.constant 0 : i32
    %c0_i32_1 = arith.constant 0 : i32
    return %c0_i32, %c0_i32_0 : i32, i32
  }
  func.func @transform_5(%arg0: i32) -> (i32, i32) {
    %c0_i32 = arith.constant 0 : i32
    %c0_i32_0 = arith.constant 0 : i32
    %c0_i32_1 = arith.constant 0 : i32
    return %c0_i32, %c0_i32_0 : i32, i32
  }
  func.func @transform_6(%arg0: i32) -> (i32, i32) {
    %c0_i32 = arith.constant 0 : i32
    %c0_i32_0 = arith.constant 0 : i32
    return %arg0, %c0_i32 : i32, i32
  }
}

</mosaic_0001>

<bundles_post_ra>
// kernel: basic_block_forward.9
= control target key start
LH: loop header
LB: loop body
LE: loop exit
PB: predicated region body
PF: predicated region fallthrough
CT: control target
= control target key end

     0   :  { %s333_s12 = smov 0   ;;  %s356_s0 = inlined_call_operand.vmem [shape: f32[128,128], index: 0, kind: input, shape index: {}]   ;;  %s357_s1 = inlined_call_operand.vmem [shape: f32[1,128], index: 1, kind: input, shape index: {}]   ;;  %s358_s2 = inlined_call_operand.vmem [shape: f32[1,128], index: 2, kind: input, shape index: {}]   ;;  %s359_s3 = inlined_call_operand.vmem [shape: f32[128,128], index: 3, kind: output, shape index: {}]  }
   0x1 LB: > { %s284_s13 = sadd.s32 4294967295, %s311_s12   ;;  %p288_p0 = scmp.ge.s32.totalorder %s311_s12, 1  ;;  %s311_s12 = sphi %s333_s12, %s13_s12  }
   0x2   : > { %p138_p1 = scmp.lt.s32.totalorder %s311_s12, 3 }
   0x4   : > { %p139_p2 = pnand %p288_p0, %p138_p1 }
   0x5   : > { %s289_s14 = sshll.u32 (!%p139_p2), %s284_s13, 3 }
   0x6   : > { %142 = sbr.rel (%p139_p2) target bundleno = 25 (0x19), region = 32  ;;  %p163_p3 = scmp.lt.s32.totalorder (!%p139_p2), %s289_s14, 15 }
   0xb   : > { %s361_s14 = smov (!%p163_p3, %s289_s14), 15  ;;  %v293_v0 = vld [vmem:[%s357_s1] ss:$0 sm:$0xff] }
   0xc   : > { %s290_s15 = sshll.u32 %s361_s14, 3  ;;  %v294_v1 = vld [vmem:[%s358_s2] ss:$0 sm:$0xff] }
   0xd   : > { %s166_s20 = scalar_lea.vmem %s356_s0, %s290_s15  ;;  %s172_s25 = scalar_lea.vmem %s359_s3, %s290_s15 }
   0xe   : > { %v174_v2 = vld [vmem:[%s166_s20] sm:$0xff]  ;;  %v175_v3 = vld [vmem:[%s166_s20 + $0x8] sm:$0xff]  ;;  %v176_v4 = vld [vmem:[%s166_s20 + $0x10] sm:$0xff] }
   0xf   : > { %v189_v5 = vmul.f32 %v293_v0, %v174_v2  ;;  %v190_v6 = vmul.f32 %v293_v0, %v175_v3  ;;  %v191_v7 = vmul.f32 %v293_v0, %v176_v4  ;;  %v177_v8 = vld [vmem:[%s166_s20 + $0x18] sm:$0xff]  ;;  %v178_v9 = vld [vmem:[%s166_s20 + $0x20] sm:$0xff]  ;;  %v179_v10 = vld [vmem:[%s166_s20 + $0x28] sm:$0xff] }
  0x10   : > { %v192_v11 = vmul.f32 %v293_v0, %v177_v8  ;;  %v193_v12 = vmul.f32 %v293_v0, %v178_v9  ;;  %v194_v13 = vmul.f32 %v293_v0, %v179_v10  ;;  %v180_v14 = vld [vmem:[%s166_s20 + $0x30] sm:$0xff]  ;;  %v181_v15 = vld [vmem:[%s166_s20 + $0x38] sm:$0xff] }
  0x11   : > { %v204_v16 = vadd.f32 %v294_v1, %v189_v5  ;;  %v205_v17 = vadd.f32 %v294_v1, %v190_v6  ;;  %v206_v18 = vadd.f32 %v294_v1, %v191_v7  ;;  %v195_v19 = vmul.f32 %v293_v0, %v180_v14 }
  0x12   : > { %v207_v20 = vadd.f32 %v294_v1, %v192_v11  ;;  %v208_v21 = vadd.f32 %v294_v1, %v193_v12  ;;  %v209_v22 = vadd.f32 %v294_v1, %v194_v13  ;;  %v196_v23 = vmul.f32 %v293_v0, %v181_v15 }
  0x13   : > { %v212_v24 = vmax.f32 %v204_v16, 0.0  ;;  %v213_v25 = vmax.f32 %v205_v17, 0.0  ;;  %v214_v26 = vmax.f32 %v206_v18, 0.0  ;;  %v210_v27 = vadd.f32 %v294_v1, %v195_v19 }
  0x14   : > { %v215_v28 = vmax.f32 %v207_v20, 0.0  ;;  %v216_v29 = vmax.f32 %v208_v21, 0.0  ;;  %v217_v30 = vmax.f32 %v209_v22, 0.0  ;;  %v211_v31 = vadd.f32 %v294_v1, %v196_v23 }
  0x15   : > { %220 = vst [vmem:[%s172_s25] sm:$0xff] %v212_v24  ;;  %221 = vst [vmem:[%s172_s25 + $0x8] sm:$0xff] %v213_v25  ;;  %v218_v32 = vmax.f32 %v210_v27, 0.0 }
  0x16   : > { %222 = vst [vmem:[%s172_s25 + $0x10] sm:$0xff] %v214_v26  ;;  %223 = vst [vmem:[%s172_s25 + $0x18] sm:$0xff] %v215_v28  ;;  %v219_v33 = vmax.f32 %v211_v31, 0.0 }
  0x17   : > { %224 = vst [vmem:[%s172_s25 + $0x20] sm:$0xff] %v216_v29  ;;  %225 = vst [vmem:[%s172_s25 + $0x28] sm:$0xff] %v217_v30 }
  0x18   : > { %226 = vst [vmem:[%s172_s25 + $0x30] sm:$0xff] %v218_v32  ;;  %227 = vst [vmem:[%s172_s25 + $0x38] sm:$0xff] %v219_v33 }
  0x19 PF: > { %s13_s12 = sadd.s32 1, %s311_s12  }
  0x1a   : > { %p10_p4 = scmp.ge.s32.totalorder %s13_s12, 4  }
  0x1c   :  { %12 = sbr.rel (!%p10_p4) target bundleno = 1 (0x1), region = 62 }

// kernel: basic_block_forward.8
= control target key start
LH: loop header
LB: loop body
LE: loop exit
PB: predicated region body
PF: predicated region fallthrough
CT: control target
= control target key end

     0   :  { %vm18_vm0 = vcmask 1041408   ;;  %s100_s0 = inlined_call_operand.vmem [shape: f32[2,2,128], index: 0, kind: input, shape index: {}]   ;;  %s101_s1 = inlined_call_operand.vmem [shape: f32[1,128], index: 1, kind: input, shape index: {}]   ;;  %s102_s3 = inlined_call_operand.vmem [shape: f32[1,128], index: 3, kind: output, shape index: {0}]   ;;  %s103_s2 = inlined_call_operand.vmem [shape: f32[1,128], index: 2, kind: input, shape index: {}]   ;;  %s104_s4 = inlined_call_operand.vmem [shape: f32[1,128], index: 4, kind: output, shape index: {1}]  }
   0x1   :  { %v16_v0 = vld [vmem:[%s100_s0] sm:$0x3]  ;;  %v17_v1 = vld [vmem:[%s100_s0 + $0x2] sm:$0x3] }
   0x2   :  { %v19_v2 = vsel %vm18_vm0, %v16_v0, 0.0  ;;  %v20_v3 = vsel %vm18_vm0, %v17_v1, 0.0  ;;  %v54_v10 = vld [vmem:[%s101_s1] ss:$0 sm:$0xff] }
   0x3   :  { %v21_v4 = vadd.f32 %v20_v3, %v19_v2  ;;  %v39_v14 = vld [vmem:[%s103_s2] sm:$0x1] }
   0x5   :  { %v22_v5 = vmul.f32 0.0078125, %v21_v4 }
   0x7   :  { %v23_v6 = vmul.f32 %v22_v5, %v22_v5 }
   0x9   :  { %v25_v7 = vrot.slane %v23_v6, 7 }
   0xb   :  { %v27_v8 = vsub.f32 %v22_v5, %v25_v7 }
   0xd   :  { %v28_v9 = vadd.f32 1e-05, %v27_v8 }
   0xf   :  { %55 = vrsqrt.f32 %v28_v9 }
  0x1c   :  { %v56_v11 = vpop.eup %55 }
  0x1d   :  { %v37_v12 = vmul.f32 %v56_v11, %v54_v10 }
  0x1f   :  { %38 = vst [vmem:[%s102_s3 - $0x1] sm:$0x2] %v37_v12  ;;  %v41_v13 = vrot.slane %v37_v12, 1 }
  0x21   :  { %v43_v15 = vmul.f32 %v41_v13, %v22_v5 }
  0x23   :  { %v44_v16 = vsub.f32 %v39_v14, %v43_v15 }
  0x25   :  { %45 = vst [vmem:[%s104_s4] sm:$0x1] %v44_v16 }

// kernel: basic_block_forward.7
= control target key start
LH: loop header
LB: loop body
LE: loop exit
PB: predicated region body
PF: predicated region fallthrough
CT: control target
= control target key end

     0   :  { %s982_s21 = smov 0   ;;  %s1144_s0 = inlined_call_operand.vmem [shape: f32[128,128], index: 0, kind: input, shape index: {}]   ;;  %s1145_s1 = inlined_call_operand.vmem [shape: f32[128,128], index: 1, kind: input, shape index: {}]   ;;  %s1146_s2 = inlined_call_operand.vmem [shape: f32[128,128], index: 2, kind: input, shape index: {}]   ;;  %s1147_s3 = inlined_call_operand.vmem [shape: f32[128,128], index: 3, kind: output, shape index: {0}]   ;;  %s1148_s4 = inlined_call_operand.vmem [shape: f32[128,128], index: 4, kind: output, shape index: {1}]   ;;  %s1149_s5 = inlined_call_operand.vmem [shape: f32[2,2,128], index: 5, kind: output, shape index: {2}]   ;;  %s1150_s6 = inlined_call_operand.vmem [shape: f32[2,2,128], index: 6, kind: output, shape index: {3}]  }
   0x1 LB: > { %s988_s22 = sadd.s32 4294967295, %s945_s21   ;;  %p784_p0 = scmp.ge.s32.totalorder %s945_s21, 1  ;;  %s945_s21 = sphi %s982_s21, %s17_s21  }
   0x2   : > { %p220_p1 = scmp.lt.s32.totalorder %s945_s21, 3 }
   0x4   : > { %p221_p2 = pnand %p784_p0, %p220_p1 }
   0x5   : > { %s785_s9 = sshll.u32 (!%p221_p2), %s988_s22, 3  ;;  %p281_p4 = scmp.lt.s32.totalorder (!%p221_p2), %s988_s22, 1 }
   0x6   : > { %224 = sbr.rel (%p221_p2) target bundleno = 273 (0x111), region = 32  ;;  %p264_p3 = scmp.lt.s32.totalorder (!%p221_p2), %s785_s9, 15 }
   0xb   : > { %v312_v0 = vld [vmem:[%s1145_s1 + $0x78] sm:$0xff]  ;;  %v311_v2 = vld [vmem:[%s1145_s1 + $0x70] sm:$0xff]  ;;  %v310_v4 = vld [vmem:[%s1145_s1 + $0x68] sm:$0xff]  ;;  %s1152_s9 = smov (!%p264_p3, %s785_s9), 15  ;;  %s1154_s22 = smov (!%p281_p4, %s988_s22), 1  ;;  %vm589_vm0 = vcmask 1040384  }
   0xc   : > { %v433_v1 = vld [vmem:[%s1146_s2 + $0x78] sm:$0xff]  ;;  %843 = vmatprep.subr.mxu0 %v312_v0  ;;  %v432_v3 = vld [vmem:[%s1146_s2 + $0x70] sm:$0xff]  ;;  %v431_v5 = vld [vmem:[%s1146_s2 + $0x68] sm:$0xff]  ;;  %s1071_s8 = sshll.u32 %s1152_s9, 3 }
   0xd   : > { %887 = vmatprep.subr.mxu1 %v433_v1  ;;  %844 = vmatpush3.msra.mxu0 %v312_v0  ;;  %v309_v6 = vld [vmem:[%s1145_s1 + $0x60] sm:$0xff]  ;;  %v308_v8 = vld [vmem:[%s1145_s1 + $0x58] sm:$0xff]  ;;  %v307_v10 = vld [vmem:[%s1145_s1 + $0x50] sm:$0xff]  ;;  %s1089_s19 = scalar_lea.vmem %s1144_s0, %s1071_s8  ;;  %s1109_s28 = scalar_lea.vmem %s1147_s3, %s1071_s8 }
   0xe   : > { %888 = vmatpush3.msra.mxu1 %v433_v1  ;;  %845 = vmatprep.subr.mxu0 %v311_v2  ;;  %v430_v7 = vld [vmem:[%s1146_s2 + $0x60] sm:$0xff]  ;;  %v429_v9 = vld [vmem:[%s1146_s2 + $0x58] sm:$0xff]  ;;  %v428_v11 = vld [vmem:[%s1146_s2 + $0x50] sm:$0xff]  ;;  %s1115_s7 = scalar_lea.vmem %s1148_s4, %s1071_s8  ;;  %s791_s8 = sshll.u32 %s1154_s22, 1 }
   0xf   : > { %889 = vmatprep.subr.mxu1 %v432_v3  ;;  %846 = vmatpush3.msra.mxu0 %v311_v2  ;;  %v306_v12 = vld [vmem:[%s1145_s1 + $0x48] sm:$0xff]  ;;  %v305_v14 = vld [vmem:[%s1145_s1 + $0x40] sm:$0xff]  ;;  %v304_v16 = vld [vmem:[%s1145_s1 + $0x38] sm:$0xff]  ;;  %s284_s12 = scalar_lea.vmem %s1149_s5, %s791_s8  ;;  %s288_s15 = scalar_lea.vmem %s1150_s6, %s791_s8 }
  0x10   : > { %890 = vmatpush3.msra.mxu1 %v432_v3  ;;  %847 = vmatprep.subr.mxu0 %v310_v4  ;;  %v427_v13 = vld [vmem:[%s1146_s2 + $0x48] sm:$0xff]  ;;  %v426_v15 = vld [vmem:[%s1146_s2 + $0x40] sm:$0xff]  ;;  %v425_v17 = vld [vmem:[%s1146_s2 + $0x38] sm:$0xff] }
  0x11   : > { %891 = vmatprep.subr.mxu1 %v431_v5  ;;  %848 = vmatpush3.msra.mxu0 %v310_v4  ;;  %v303_v18 = vld [vmem:[%s1145_s1 + $0x30] sm:$0xff]  ;;  %v302_v20 = vld [vmem:[%s1145_s1 + $0x28] sm:$0xff]  ;;  %v301_v22 = vld [vmem:[%s1145_s1 + $0x20] sm:$0xff] }
  0x12   : > { %892 = vmatpush3.msra.mxu1 %v431_v5  ;;  %849 = vmatprep.subr.mxu0 %v309_v6  ;;  %v424_v19 = vld [vmem:[%s1146_s2 + $0x30] sm:$0xff]  ;;  %v423_v21 = vld [vmem:[%s1146_s2 + $0x28] sm:$0xff]  ;;  %v422_v23 = vld [vmem:[%s1146_s2 + $0x20] sm:$0xff] }
  0x13   : > { %893 = vmatprep.subr.mxu1 %v430_v7  ;;  %850 = vmatpush3.msra.mxu0 %v309_v6  ;;  %v300_v24 = vld [vmem:[%s1145_s1 + $0x18] sm:$0xff]  ;;  %v299_v26 = vld [vmem:[%s1145_s1 + $0x10] sm:$0xff]  ;;  %v298_v28 = vld [vmem:[%s1145_s1 + $0x8] sm:$0xff] }
  0x14   : > { %894 = vmatpush3.msra.mxu1 %v430_v7  ;;  %851 = vmatprep.subr.mxu0 %v308_v8  ;;  %v421_v25 = vld [vmem:[%s1146_s2 + $0x18] sm:$0xff]  ;;  %v420_v27 = vld [vmem:[%s1146_s2 + $0x10] sm:$0xff]  ;;  %v419_v29 = vld [vmem:[%s1146_s2 + $0x8] sm:$0xff] }
  0x15   : > { %895 = vmatprep.subr.mxu1 %v429_v9  ;;  %852 = vmatpush3.msra.mxu0 %v308_v8  ;;  %v297_v30 = vld [vmem:[%s1145_s1] sm:$0xff]  ;;  %v290_v33 = vld [vmem:[%s1089_s19 + $0x8] sm:$0xff]  ;;  %v291_v34 = vld [vmem:[%s1089_s19 + $0x10] sm:$0xff] }
  0x16   : > { %896 = vmatpush3.msra.mxu1 %v429_v9  ;;  %853 = vmatprep.subr.mxu0 %v307_v10  ;;  %v418_v31 = vld [vmem:[%s1146_s2] sm:$0xff]  ;;  %v292_v35 = vld [vmem:[%s1089_s19 + $0x18] sm:$0xff]  ;;  %v294_v37 = vld [vmem:[%s1089_s19 + $0x28] sm:$0xff] }
  0x17   : > { %897 = vmatprep.subr.mxu1 %v428_v11  ;;  %854 = vmatpush3.msra.mxu0 %v307_v10  ;;  %v289_v32 = vld [vmem:[%s1089_s19] sm:$0xff]  ;;  %v295_v38 = vld [vmem:[%s1089_s19 + $0x30] sm:$0xff]  ;;  %v296_v39 = vld [vmem:[%s1089_s19 + $0x38] sm:$0xff] }
  0x18   : > { %898 = vmatpush3.msra.mxu1 %v428_v11  ;;  %855 = vmatprep.subr.mxu0 %v306_v12  ;;  %v293_v36 = vld [vmem:[%s1089_s19 + $0x20] sm:$0xff] }
  0x19   : > { %899 = vmatprep.subr.mxu1 %v427_v13  ;;  %856 = vmatpush3.msra.mxu0 %v306_v12 }
  0x1a   : > { %900 = vmatpush3.msra.mxu1 %v427_v13  ;;  %857 = vmatprep.subr.mxu0 %v305_v14 }
  0x1b   : > { %901 = vmatprep.subr.mxu1 %v426_v15  ;;  %858 = vmatpush3.msra.mxu0 %v305_v14 }
  0x1c   : > { %902 = vmatpush3.msra.mxu1 %v426_v15  ;;  %859 = vmatprep.subr.mxu0 %v304_v16 }
  0x1d   : > { %903 = vmatprep.subr.mxu1 %v425_v17  ;;  %860 = vmatpush3.msra.mxu0 %v304_v16 }
  0x1e   : > { %904 = vmatpush3.msra.mxu1 %v425_v17  ;;  %861 = vmatprep.subr.mxu0 %v303_v18 }
  0x1f   : > { %905 = vmatprep.subr.mxu1 %v424_v19  ;;  %862 = vmatpush3.msra.mxu0 %v303_v18 }
  0x20   : > { %906 = vmatpush3.msra.mxu1 %v424_v19  ;;  %863 = vmatprep.subr.mxu0 %v302_v20 }
  0x21   : > { %907 = vmatprep.subr.mxu1 %v423_v21  ;;  %864 = vmatpush3.msra.mxu0 %v302_v20 }
  0x22   : > { %908 = vmatpush3.msra.mxu1 %v423_v21  ;;  %865 = vmatprep.subr.mxu0 %v301_v22 }
  0x23   : > { %909 = vmatprep.subr.mxu1 %v422_v23  ;;  %866 = vmatpush3.msra.mxu0 %v301_v22 }
  0x24   : > { %910 = vmatpush3.msra.mxu1 %v422_v23  ;;  %867 = vmatprep.subr.mxu0 %v300_v24 }
  0x25   : > { %911 = vmatprep.subr.mxu1 %v421_v25  ;;  %868 = vmatpush3.msra.mxu0 %v300_v24 }
  0x26   : > { %912 = vmatpush3.msra.mxu1 %v421_v25  ;;  %869 = vmatprep.subr.mxu0 %v299_v26 }
  0x27   : > { %913 = vmatprep.subr.mxu1 %v420_v27  ;;  %870 = vmatpush3.msra.mxu0 %v299_v26 }
  0x28   : > { %914 = vmatpush3.msra.mxu1 %v420_v27  ;;  %871 = vmatprep.subr.mxu0 %v298_v28 }
  0x29   : > { %915 = vmatprep.subr.mxu1 %v419_v29  ;;  %872 = vmatpush3.msra.mxu0 %v298_v28 }
  0x2a   : > { %916 = vmatpush3.msra.mxu1 %v419_v29  ;;  %873 = vmatprep.subr.mxu0 %v297_v30 }
  0x2b   : > { %917 = vmatprep.subr.mxu1 %v418_v31  ;;  %874 = vmatpush3.msra.mxu0 %v297_v30 }
  0x2c   : > { %875 = vmatprep.mubr.f32.mxu0 %v289_v32  ;;  %918 = vmatpush3.msra.mxu1 %v418_v31 }
  0x2d   : > { %919 = vmatprep.mubr.f32.mxu1 %v289_v32  ;;  %876 = vmatmul.mubr.f32.vlgmr.msra.gmra.mxu0 %v290_v33 }
  0x2e   : > { %920 = vmatmul.mubr.f32.vlgmr.msra.gmra.mxu1 %v290_v33  ;;  %878 = vmatprep.mubr.f32.mxu0 %v291_v34 }
  0x2f   : > { %922 = vmatprep.mubr.f32.mxu1 %v291_v34 }
  0x31   : > { %879 = vmatmul.mubr.f32.gmra.mxu0 %v292_v35 }
  0x32   : > { %923 = vmatmul.mubr.f32.gmra.mxu1 %v292_v35  ;;  %881 = vmatprep.mubr.f32.mxu0 %v293_v36 }
  0x33   : > { %925 = vmatprep.mubr.f32.mxu1 %v293_v36 }
  0x35   : > { %882 = vmatmul.mubr.f32.gmra.mxu0 %v294_v37 }
  0x36   : > { %926 = vmatmul.mubr.f32.gmra.mxu1 %v294_v37  ;;  %884 = vmatprep.mubr.f32.mxu0 %v295_v38 }
  0x37   : > { %928 = vmatprep.mubr.f32.mxu1 %v295_v38 }
  0x39   : > { %885 = vmatmul.mubr.f32.gmra.mxu0 %v296_v39 }
  0x3a   : > { %929 = vmatmul.mubr.f32.gmra.mxu1 %v296_v39 }
  0xed   : > { %v877_v40 = vpop.f32.mrf.mxu0 }
  0xee   : > { %v921_v41 = vpop.f32.mrf.mxu1  ;;  %540 = vst [vmem:[%s1109_s28 + $0x8] sm:$0xff] %v877_v40  ;;  %v569_v46 = vmul.f32 %v877_v40, %v877_v40 }
  0xef   : > { %548 = vst [vmem:[%s1115_s7 + $0x8] sm:$0xff] %v921_v41  ;;  %v379_v42 = vpop.f32.mrf.mxu0  ;;  %v606_v47 = vmul.f32 %v921_v41, %v921_v41 }
  0xf0   : > { %v500_v43 = vpop.f32.mrf.mxu1  ;;  %539 = vst [vmem:[%s1109_s28] sm:$0xff] %v379_v42  ;;  %v568_v44 = vmul.f32 %v379_v42, %v379_v42  ;;  %v555_v50 = vadd.f32 %v877_v40, %v379_v42 }
  0xf1   : > { %547 = vst [vmem:[%s1115_s7] sm:$0xff] %v500_v43  ;;  %v605_v45 = vmul.f32 %v500_v43, %v500_v43  ;;  %v880_v48 = vpop.f32.mrf.mxu0  ;;  %v592_v51 = vadd.f32 %v921_v41, %v500_v43 }
  0xf2   : > { %v924_v49 = vpop.f32.mrf.mxu1  ;;  %542 = vst [vmem:[%s1109_s28 + $0x18] sm:$0xff] %v880_v48  ;;  %v576_v52 = vadd.f32 %v569_v46, %v568_v44  ;;  %v571_v62 = vmul.f32 %v880_v48, %v880_v48 }
  0xf3   : > { %550 = vst [vmem:[%s1115_s7 + $0x18] sm:$0xff] %v924_v49  ;;  %v613_v53 = vadd.f32 %v606_v47, %v605_v45  ;;  %v389_v54 = vpop.f32.mrf.mxu0  ;;  %v608_v63 = vmul.f32 %v924_v49, %v924_v49 }
  0xf4   : > { %v510_v55 = vpop.f32.mrf.mxu1  ;;  %541 = vst [vmem:[%s1109_s28 + $0x10] sm:$0xff] %v389_v54  ;;  %v556_v56 = vadd.f32 %v555_v50, %v389_v54  ;;  %v570_v57 = vmul.f32 %v389_v54, %v389_v54 }
  0xf5   : > { %549 = vst [vmem:[%s1115_s7 + $0x10] sm:$0xff] %v510_v55  ;;  %v593_v58 = vadd.f32 %v592_v51, %v510_v55  ;;  %v607_v59 = vmul.f32 %v510_v55, %v510_v55  ;;  %v883_v60 = vpop.f32.mrf.mxu0 }
  0xf6   : > { %v927_v61 = vpop.f32.mrf.mxu1  ;;  %v577_v0 = vadd.f32 %v576_v52, %v570_v57  ;;  %544 = vst [vmem:[%s1109_s28 + $0x28] sm:$0xff] %v883_v60  ;;  %v557_v3 = vadd.f32 %v880_v48, %v556_v56  ;;  %v573_v14 = vmul.f32 %v883_v60, %v883_v60 }
  0xf7   : > { %v614_v1 = vadd.f32 %v613_v53, %v607_v59  ;;  %552 = vst [vmem:[%s1115_s7 + $0x28] sm:$0xff] %v927_v61  ;;  %v399_v2 = vpop.f32.mrf.mxu0  ;;  %v594_v5 = vadd.f32 %v924_v49, %v593_v58  ;;  %v610_v15 = vmul.f32 %v927_v61, %v927_v61 }
  0xf8   : > { %v520_v4 = vpop.f32.mrf.mxu1  ;;  %543 = vst [vmem:[%s1109_s28 + $0x20] sm:$0xff] %v399_v2  ;;  %v572_v6 = vmul.f32 %v399_v2, %v399_v2  ;;  %v578_v7 = vadd.f32 %v577_v0, %v571_v62  ;;  %v558_v10 = vadd.f32 %v557_v3, %v399_v2 }
  0xf9   : > { %551 = vst [vmem:[%s1115_s7 + $0x20] sm:$0xff] %v520_v4  ;;  %v609_v8 = vmul.f32 %v520_v4, %v520_v4  ;;  %v615_v9 = vadd.f32 %v614_v1, %v608_v63  ;;  %v595_v11 = vadd.f32 %v594_v5, %v520_v4  ;;  %v886_v12 = vpop.f32.mrf.mxu0 }
  0xfa   : > { %v930_v13 = vpop.f32.mrf.mxu1  ;;  %v579_v16 = vadd.f32 %v578_v7, %v572_v6  ;;  %546 = vst [vmem:[%s1109_s28 + $0x38] sm:$0xff] %v886_v12  ;;  %v559_v19 = vadd.f32 %v883_v60, %v558_v10  ;;  %v575_v28 = vmul.f32 %v886_v12, %v886_v12 }
  0xfb   : > { %v616_v17 = vadd.f32 %v615_v9, %v609_v8  ;;  %554 = vst [vmem:[%s1115_s7 + $0x38] sm:$0xff] %v930_v13  ;;  %v409_v18 = vpop.f32.mrf.mxu0  ;;  %v596_v21 = vadd.f32 %v927_v61, %v595_v11  ;;  %v612_v29 = vmul.f32 %v930_v13, %v930_v13 }
  0xfc   : > { %v530_v20 = vpop.f32.mrf.mxu1  ;;  %545 = vst [vmem:[%s1109_s28 + $0x30] sm:$0xff] %v409_v18  ;;  %v574_v22 = vmul.f32 %v409_v18, %v409_v18  ;;  %v580_v23 = vadd.f32 %v579_v16, %v573_v14  ;;  %v560_v26 = vadd.f32 %v559_v19, %v409_v18 }
  0xfd   : > { %553 = vst [vmem:[%s1115_s7 + $0x30] sm:$0xff] %v530_v20  ;;  %v611_v24 = vmul.f32 %v530_v20, %v530_v20  ;;  %v617_v25 = vadd.f32 %v616_v17, %v610_v15  ;;  %v597_v27 = vadd.f32 %v596_v21, %v530_v20 }
  0xfe   : > { %v581_v30 = vadd.f32 %v580_v23, %v574_v22  ;;  %v561_v32 = vadd.f32 %v886_v12, %v560_v26 }
  0xff   : > { %v618_v31 = vadd.f32 %v617_v25, %v611_v24  ;;  %v598_v33 = vadd.f32 %v930_v13, %v597_v27 }
 0x100   : > { %v582_v34 = vadd.f32 %v581_v30, %v575_v28  ;;  %v562_v36 = vrot.slane %v561_v32, 4 }
 0x101   : > { %v619_v35 = vadd.f32 %v618_v31, %v612_v29  ;;  %v599_v37 = vrot.slane %v598_v33, 4 }
 0x102   : > { %v583_v38 = vrot.slane %v582_v34, 4  ;;  %v563_v40 = vadd.f32 %v562_v36, %v561_v32 }
 0x103   : > { %v620_v39 = vrot.slane %v619_v35, 4  ;;  %v600_v41 = vadd.f32 %v599_v37, %v598_v33 }
 0x104   : > { %v584_v42 = vadd.f32 %v583_v38, %v582_v34  ;;  %v564_v44 = vrot.slane %v563_v40, 2 }
 0x105   : > { %v621_v43 = vadd.f32 %v620_v39, %v619_v35  ;;  %v601_v45 = vrot.slane %v600_v41, 2 }
 0x106   : > { %v585_v46 = vrot.slane %v584_v42, 2  ;;  %v565_v48 = vadd.f32 %v564_v44, %v563_v40 }
 0x107   : > { %v622_v47 = vrot.slane %v621_v43, 2  ;;  %v602_v49 = vadd.f32 %v601_v45, %v600_v41 }
 0x108   : > { %v586_v50 = vadd.f32 %v585_v46, %v584_v42  ;;  %v566_v52 = vrot.slane %v565_v48, 1 }
 0x109   : > { %v623_v51 = vadd.f32 %v622_v47, %v621_v43  ;;  %v603_v53 = vrot.slane %v602_v49, 1 }
 0x10a   : > { %v587_v54 = vrot.slane %v586_v50, 1  ;;  %v567_v56 = vadd.f32 %v566_v52, %v565_v48 }
 0x10b   : > { %v624_v55 = vrot.slane %v623_v51, 1  ;;  %v604_v58 = vadd.f32 %v603_v53, %v602_v49 }
 0x10c   : > { %v588_v57 = vadd.f32 %v587_v54, %v586_v50 }
 0x10d   : > { %v625_v59 = vadd.f32 %v624_v55, %v623_v51 }
 0x10e   : > { %v590_v60 = vsel %vm589_vm0, %v567_v56, %v588_v57 }
 0x10f   : > { %v626_v61 = vsel %vm589_vm0, %v604_v58, %v625_v59  ;;  %591 = vst [vmem:[%s284_s12] sm:$0x3] %v590_v60 }
 0x110   : > { %627 = vst [vmem:[%s288_s15] sm:$0x3] %v626_v61 }
 0x111 PF: > { %s17_s21 = sadd.s32 1, %s945_s21  }
 0x112   : > { %p14_p5 = scmp.ge.s32.totalorder %s17_s21, 4  }
 0x114   :  { %16 = sbr.rel (!%p14_p5) target bundleno = 1 (0x1), region = 98 }

// kernel: basic_block_forward.10
= control target key start
LH: loop header
LB: loop body
LE: loop exit
PB: predicated region body
PF: predicated region fallthrough
CT: control target
= control target key end

     0   :  { %s594_s12 = smov 0   ;;  %s684_s0 = inlined_call_operand.vmem [shape: f32[128,128], index: 0, kind: input, shape index: {}]   ;;  %s685_s1 = inlined_call_operand.vmem [shape: f32[128,128], index: 1, kind: input, shape index: {}]   ;;  %s686_s2 = inlined_call_operand.vmem [shape: f32[128,128], index: 2, kind: output, shape index: {0}]   ;;  %s687_s3 = inlined_call_operand.vmem [shape: f32[2,2,128], index: 3, kind: output, shape index: {1}]  }
   0x1 LB: > { %s600_s13 = sadd.s32 4294967295, %s572_s12   ;;  %p450_p0 = scmp.ge.s32.totalorder %s572_s12, 1  ;;  %s572_s12 = sphi %s594_s12, %s14_s12  }
   0x2   : > { %p141_p1 = scmp.lt.s32.totalorder %s572_s12, 3 }
   0x4   : > { %p142_p2 = pnand %p450_p0, %p141_p1 }
   0x5   : > { %s451_s24 = sshll.u32 (!%p142_p2), %s600_s13, 3  ;;  %p181_p4 = scmp.lt.s32.totalorder (!%p142_p2), %s600_s13, 1 }
   0x6   : > { %145 = sbr.rel (%p142_p2) target bundleno = 271 (0x10f), region = 28  ;;  %p170_p3 = scmp.lt.s32.totalorder (!%p142_p2), %s451_s24, 15 }
   0xb   : > { %v208_v0 = vld [vmem:[%s685_s1 + $0x78] sm:$0xff]  ;;  %v207_v1 = vld [vmem:[%s685_s1 + $0x70] sm:$0xff]  ;;  %v206_v2 = vld [vmem:[%s685_s1 + $0x68] sm:$0xff]  ;;  %s689_s24 = smov (!%p170_p3, %s451_s24), 15  ;;  %s691_s13 = smov (!%p181_p4, %s600_s13), 1  ;;  %vm356_vm0 = vcmask 1040384  }
   0xc   : > { %482 = vmatprep.subr.mxu0 %v208_v0  ;;  %526 = vmatprep.subr.mxu1 %v208_v0  ;;  %v205_v3 = vld [vmem:[%s685_s1 + $0x60] sm:$0xff]  ;;  %v204_v4 = vld [vmem:[%s685_s1 + $0x58] sm:$0xff]  ;;  %v203_v5 = vld [vmem:[%s685_s1 + $0x50] sm:$0xff]  ;;  %s452_s10 = sshll.u32 %s689_s24, 3  ;;  %s455_s24 = sshll.u32 %s691_s13, 1 }
   0xd   : > { %483 = vmatpush3.msra.mxu0 %v208_v0  ;;  %542 = vmatpush3.msra.mxu1 %v208_v0  ;;  %v202_v6 = vld [vmem:[%s685_s1 + $0x48] sm:$0xff]  ;;  %v201_v7 = vld [vmem:[%s685_s1 + $0x40] sm:$0xff]  ;;  %v200_v8 = vld [vmem:[%s685_s1 + $0x38] sm:$0xff]  ;;  %s649_s17 = scalar_lea.vmem %s684_s0, %s452_s10  ;;  %s179_s29 = scalar_lea.vmem %s686_s2, %s452_s10 }
   0xe   : > { %484 = vmatprep.subr.mxu0 %v207_v1  ;;  %527 = vmatprep.subr.mxu1 %v207_v1  ;;  %v199_v9 = vld [vmem:[%s685_s1 + $0x30] sm:$0xff]  ;;  %v198_v10 = vld [vmem:[%s685_s1 + $0x28] sm:$0xff]  ;;  %v197_v11 = vld [vmem:[%s685_s1 + $0x20] sm:$0xff]  ;;  %s184_s5 = scalar_lea.vmem %s687_s3, %s455_s24 }
   0xf   : > { %485 = vmatpush3.msra.mxu0 %v207_v1  ;;  %543 = vmatpush3.msra.mxu1 %v207_v1  ;;  %v196_v12 = vld [vmem:[%s685_s1 + $0x18] sm:$0xff]  ;;  %v195_v13 = vld [vmem:[%s685_s1 + $0x10] sm:$0xff]  ;;  %v185_v14 = vld [vmem:[%s649_s17] sm:$0xff] }
  0x10   : > { %486 = vmatprep.subr.mxu0 %v206_v2  ;;  %528 = vmatprep.subr.mxu1 %v206_v2  ;;  %v194_v15 = vld [vmem:[%s685_s1 + $0x8] sm:$0xff]  ;;  %v193_v16 = vld [vmem:[%s685_s1] sm:$0xff]  ;;  %v187_v18 = vld [vmem:[%s649_s17 + $0x10] sm:$0xff] }
  0x11   : > { %487 = vmatpush3.msra.mxu0 %v206_v2  ;;  %544 = vmatpush3.msra.mxu1 %v206_v2  ;;  %v186_v17 = vld [vmem:[%s649_s17 + $0x8] sm:$0xff]  ;;  %v189_v19 = vld [vmem:[%s649_s17 + $0x20] sm:$0xff]  ;;  %v191_v21 = vld [vmem:[%s649_s17 + $0x30] sm:$0xff] }
  0x12   : > { %488 = vmatprep.subr.mxu0 %v205_v3  ;;  %529 = vmatprep.subr.mxu1 %v205_v3  ;;  %v190_v20 = vld [vmem:[%s649_s17 + $0x28] sm:$0xff]  ;;  %v188_v22 = vld [vmem:[%s649_s17 + $0x18] sm:$0xff] }
  0x13   : > { %489 = vmatpush3.msra.mxu0 %v205_v3  ;;  %545 = vmatpush3.msra.mxu1 %v205_v3  ;;  %v192_v23 = vld [vmem:[%s649_s17 + $0x38] sm:$0xff] }
  0x14   : > { %490 = vmatprep.subr.mxu0 %v204_v4  ;;  %530 = vmatprep.subr.mxu1 %v204_v4 }
  0x15   : > { %491 = vmatpush3.msra.mxu0 %v204_v4  ;;  %546 = vmatpush3.msra.mxu1 %v204_v4 }
  0x16   : > { %492 = vmatprep.subr.mxu0 %v203_v5  ;;  %531 = vmatprep.subr.mxu1 %v203_v5 }
  0x17   : > { %493 = vmatpush3.msra.mxu0 %v203_v5  ;;  %547 = vmatpush3.msra.mxu1 %v203_v5 }
  0x18   : > { %494 = vmatprep.subr.mxu0 %v202_v6  ;;  %532 = vmatprep.subr.mxu1 %v202_v6 }
  0x19   : > { %495 = vmatpush3.msra.mxu0 %v202_v6  ;;  %548 = vmatpush3.msra.mxu1 %v202_v6 }
  0x1a   : > { %496 = vmatprep.subr.mxu0 %v201_v7  ;;  %533 = vmatprep.subr.mxu1 %v201_v7 }
  0x1b   : > { %497 = vmatpush3.msra.mxu0 %v201_v7  ;;  %549 = vmatpush3.msra.mxu1 %v201_v7 }
  0x1c   : > { %498 = vmatprep.subr.mxu0 %v200_v8  ;;  %534 = vmatprep.subr.mxu1 %v200_v8 }
  0x1d   : > { %499 = vmatpush3.msra.mxu0 %v200_v8  ;;  %550 = vmatpush3.msra.mxu1 %v200_v8 }
  0x1e   : > { %500 = vmatprep.subr.mxu0 %v199_v9  ;;  %535 = vmatprep.subr.mxu1 %v199_v9 }
  0x1f   : > { %501 = vmatpush3.msra.mxu0 %v199_v9  ;;  %551 = vmatpush3.msra.mxu1 %v199_v9 }
  0x20   : > { %502 = vmatprep.subr.mxu0 %v198_v10  ;;  %536 = vmatprep.subr.mxu1 %v198_v10 }
  0x21   : > { %503 = vmatpush3.msra.mxu0 %v198_v10  ;;  %552 = vmatpush3.msra.mxu1 %v198_v10 }
  0x22   : > { %504 = vmatprep.subr.mxu0 %v197_v11  ;;  %537 = vmatprep.subr.mxu1 %v197_v11 }
  0x23   : > { %505 = vmatpush3.msra.mxu0 %v197_v11  ;;  %553 = vmatpush3.msra.mxu1 %v197_v11 }
  0x24   : > { %506 = vmatprep.subr.mxu0 %v196_v12  ;;  %538 = vmatprep.subr.mxu1 %v196_v12 }
  0x25   : > { %507 = vmatpush3.msra.mxu0 %v196_v12  ;;  %554 = vmatpush3.msra.mxu1 %v196_v12 }
  0x26   : > { %508 = vmatprep.subr.mxu0 %v195_v13  ;;  %514 = vmatprep.mubr.f32.mxu0 %v185_v14 }
  0x27   : > { %509 = vmatpush3.msra.mxu0 %v195_v13  ;;  %539 = vmatprep.subr.mxu1 %v195_v13 }
  0x28   : > { %510 = vmatprep.subr.mxu0 %v194_v15  ;;  %555 = vmatpush3.msra.mxu1 %v195_v13 }
  0x29   : > { %511 = vmatpush3.msra.mxu0 %v194_v15  ;;  %540 = vmatprep.subr.mxu1 %v194_v15 }
  0x2a   : > { %512 = vmatprep.subr.mxu0 %v193_v16  ;;  %556 = vmatpush3.msra.mxu1 %v194_v15 }
  0x2b   : > { %513 = vmatpush3.msra.mxu0 %v193_v16  ;;  %541 = vmatprep.subr.mxu1 %v193_v16 }
  0x2c   : > { %515 = vmatmul.mubr.f32.vlgmr.msra.gmra.mxu0 %v186_v17  ;;  %557 = vmatpush3.msra.mxu1 %v193_v16 }
  0x2d   : > { %517 = vmatprep.mubr.f32.mxu0 %v187_v18  ;;  %520 = vmatprep.mubr.f32.mxu1 %v189_v19 }
  0x2e   : > { %521 = vmatmul.mubr.f32.vlgmr.msra.gmra.mxu1 %v190_v20 }
  0x2f   : > { %523 = vmatprep.mubr.f32.mxu1 %v191_v21 }
  0x30   : > { %518 = vmatmul.mubr.f32.gmra.mxu0 %v188_v22 }
  0x32   : > { %524 = vmatmul.mubr.f32.gmra.mxu1 %v192_v23 }
  0xec   : > { %v516_v24 = vpop.f32.mrf.mxu0 }
  0xed   : > { %315 = vst [vmem:[%s179_s29 + $0x8] sm:$0xff] %v516_v24  ;;  %v336_v30 = vmul.f32 %v516_v24, %v516_v24 }
  0xee   : > { %v275_v25 = vpop.f32.mrf.mxu0  ;;  %v522_v26 = vpop.f32.mrf.mxu1 }
  0xef   : > { %314 = vst [vmem:[%s179_s29] sm:$0xff] %v275_v25  ;;  %v335_v27 = vmul.f32 %v275_v25, %v275_v25  ;;  %319 = vst [vmem:[%s179_s29 + $0x28] sm:$0xff] %v522_v26  ;;  %v322_v31 = vadd.f32 %v516_v24, %v275_v25  ;;  %v340_v44 = vmul.f32 %v522_v26, %v522_v26 }
  0xf0   : > { %v519_v28 = vpop.f32.mrf.mxu0  ;;  %v295_v29 = vpop.f32.mrf.mxu1 }
  0xf1   : > { %317 = vst [vmem:[%s179_s29 + $0x18] sm:$0xff] %v519_v28  ;;  %318 = vst [vmem:[%s179_s29 + $0x20] sm:$0xff] %v295_v29  ;;  %v343_v34 = vadd.f32 %v336_v30, %v335_v27  ;;  %v338_v38 = vmul.f32 %v519_v28, %v519_v28  ;;  %v339_v43 = vmul.f32 %v295_v29, %v295_v29 }
  0xf2   : > { %v285_v32 = vpop.f32.mrf.mxu0  ;;  %v525_v33 = vpop.f32.mrf.mxu1 }
  0xf3   : > { %316 = vst [vmem:[%s179_s29 + $0x10] sm:$0xff] %v285_v32  ;;  %v323_v35 = vadd.f32 %v322_v31, %v285_v32  ;;  %v337_v36 = vmul.f32 %v285_v32, %v285_v32  ;;  %321 = vst [vmem:[%s179_s29 + $0x38] sm:$0xff] %v525_v33  ;;  %v342_v50 = vmul.f32 %v525_v33, %v525_v33 }
  0xf4   : > { %v305_v37 = vpop.f32.mrf.mxu1 }
  0xf5   : > { %v324_v39 = vadd.f32 %v519_v28, %v323_v35  ;;  %v344_v40 = vadd.f32 %v343_v34, %v337_v36  ;;  %320 = vst [vmem:[%s179_s29 + $0x30] sm:$0xff] %v305_v37  ;;  %v341_v48 = vmul.f32 %v305_v37, %v305_v37 }
  0xf7   : > { %v345_v41 = vadd.f32 %v344_v40, %v338_v38  ;;  %v325_v42 = vadd.f32 %v324_v39, %v295_v29 }
  0xf9   : > { %v346_v45 = vadd.f32 %v345_v41, %v339_v43  ;;  %v326_v46 = vadd.f32 %v522_v26, %v325_v42 }
  0xfb   : > { %v327_v47 = vadd.f32 %v326_v46, %v305_v37  ;;  %v347_v49 = vadd.f32 %v346_v45, %v340_v44 }
  0xfd   : > { %v328_v51 = vadd.f32 %v525_v33, %v327_v47  ;;  %v348_v52 = vadd.f32 %v347_v49, %v341_v48 }
  0xff   : > { %v329_v53 = vrot.slane %v328_v51, 4  ;;  %v349_v54 = vadd.f32 %v348_v52, %v342_v50 }
 0x101   : > { %v330_v55 = vadd.f32 %v329_v53, %v328_v51  ;;  %v350_v56 = vrot.slane %v349_v54, 4 }
 0x103   : > { %v331_v57 = vrot.slane %v330_v55, 2  ;;  %v351_v58 = vadd.f32 %v350_v56, %v349_v54 }
 0x105   : > { %v332_v59 = vadd.f32 %v331_v57, %v330_v55  ;;  %v352_v60 = vrot.slane %v351_v58, 2 }
 0x107   : > { %v333_v61 = vrot.slane %v332_v59, 1  ;;  %v353_v62 = vadd.f32 %v352_v60, %v351_v58 }
 0x109   : > { %v354_v63 = vrot.slane %v353_v62, 1  ;;  %v334_v0 = vadd.f32 %v333_v61, %v332_v59 }
 0x10b   : > { %v355_v1 = vadd.f32 %v354_v63, %v353_v62 }
 0x10d   : > { %v357_v2 = vsel %vm356_vm0, %v334_v0, %v355_v1 }
 0x10e   : > { %358 = vst [vmem:[%s184_s5] sm:$0x3] %v357_v2 }
 0x10f PF: > { %s14_s12 = sadd.s32 1, %s572_s12  }
 0x110   : > { %p11_p5 = scmp.ge.s32.totalorder %s14_s12, 4  }
 0x112   :  { %13 = sbr.rel (!%p11_p5) target bundleno = 1 (0x1), region = 70 }

// kernel: basic_block_forward.13
= control target key start
LH: loop header
LB: loop body
LE: loop exit
PB: predicated region body
PF: predicated region fallthrough
CT: control target
= control target key end

     0   :  { %s521_s21 = smov 0   ;;  %s628_s0 = inlined_call_operand.vmem [shape: f32[128,128], index: 0, kind: input, shape index: {}]   ;;  %s629_s1 = inlined_call_operand.vmem [shape: f32[1,128], index: 1, kind: input, shape index: {}]   ;;  %s630_s2 = inlined_call_operand.vmem [shape: f32[1,128], index: 2, kind: input, shape index: {}]   ;;  %s631_s3 = inlined_call_operand.vmem [shape: f32[128,128], index: 3, kind: input, shape index: {}]   ;;  %s632_s4 = inlined_call_operand.vmem [shape: f32[1,128], index: 4, kind: input, shape index: {}]   ;;  %s633_s5 = inlined_call_operand.vmem [shape: f32[1,128], index: 5, kind: input, shape index: {}]   ;;  %s634_s6 = inlined_call_operand.vmem [shape: f32[128,128], index: 6, kind: output, shape index: {}]  }
   0x1 LB: > { %s453_s22 = sadd.s32 4294967295, %s484_s21   ;;  %p457_p0 = scmp.ge.s32.totalorder %s484_s21, 1  ;;  %s484_s21 = sphi %s521_s21, %s16_s21  }
   0x2   : > { %p224_p1 = scmp.lt.s32.totalorder %s484_s21, 3 }
   0x4   : > { %p225_p2 = pnand %p457_p0, %p224_p1 }
   0x5   : > { %s458_s23 = sshll.u32 (!%p225_p2), %s453_s22, 3 }
   0x6   : > { %228 = sbr.rel (%p225_p2) target bundleno = 37 (0x25), region = 44  ;;  %p260_p3 = scmp.lt.s32.totalorder (!%p225_p2), %s458_s23, 15 }
   0xb   : > { %s636_s23 = smov (!%p260_p3, %s458_s23), 15  ;;  %v534_v0 = vld [vmem:[%s629_s1] ss:$0 sm:$0xff] }
   0xc   : > { %s529_s24 = sshll.u32 %s636_s23, 3  ;;  %v539_v1 = vld [vmem:[%s632_s4] ss:$0 sm:$0xff] }
   0xd   : > { %s545_s7 = scalar_lea.vmem %s628_s0, %s529_s24  ;;  %s551_s10 = scalar_lea.vmem %s631_s3, %s529_s24  ;;  %v556_v2 = vld [vmem:[%s630_s2] ss:$0 sm:$0xff] }
   0xe   : > { %v561_v3 = vld [vmem:[%s633_s5] ss:$0 sm:$0xff]  ;;  %v278_v6 = vld [vmem:[%s545_s7 + $0x8] sm:$0xff]  ;;  %v279_v11 = vld [vmem:[%s545_s7 + $0x10] sm:$0xff]  ;;  %s600_s17 = scalar_lea.vmem %s634_s6, %s529_s24 }
   0xf   : > { %v277_v4 = vld [vmem:[%s545_s7] sm:$0xff]  ;;  %v293_v9 = vmul.f32 %v534_v0, %v278_v6  ;;  %v324_v10 = vld [vmem:[%s551_s10 + $0x8] sm:$0xff]  ;;  %v325_v12 = vld [vmem:[%s551_s10 + $0x10] sm:$0xff]  ;;  %v294_v14 = vmul.f32 %v534_v0, %v279_v11 }
  0x10   : > { %v323_v5 = vld [vmem:[%s551_s10] sm:$0xff]  ;;  %v292_v7 = vmul.f32 %v534_v0, %v277_v4  ;;  %v339_v13 = vmul.f32 %v539_v1, %v324_v10  ;;  %v340_v15 = vmul.f32 %v539_v1, %v325_v12  ;;  %v280_v16 = vld [vmem:[%s545_s7 + $0x18] sm:$0xff]  ;;  %v282_v24 = vld [vmem:[%s545_s7 + $0x28] sm:$0xff] }
  0x11   : > { %v338_v8 = vmul.f32 %v539_v1, %v323_v5  ;;  %v326_v17 = vld [vmem:[%s551_s10 + $0x18] sm:$0xff]  ;;  %v281_v18 = vld [vmem:[%s545_s7 + $0x20] sm:$0xff]  ;;  %v308_v21 = vadd.f32 %v556_v2, %v293_v9  ;;  %v295_v22 = vmul.f32 %v534_v0, %v280_v16  ;;  %v309_v26 = vadd.f32 %v556_v2, %v294_v14  ;;  %v328_v33 = vld [vmem:[%s551_s10 + $0x28] sm:$0xff] }
  0x12   : > { %v307_v19 = vadd.f32 %v556_v2, %v292_v7  ;;  %v327_v23 = vld [vmem:[%s551_s10 + $0x20] sm:$0xff]  ;;  %v354_v25 = vadd.f32 %v561_v3, %v339_v13  ;;  %v355_v27 = vadd.f32 %v561_v3, %v340_v15  ;;  %v341_v28 = vmul.f32 %v539_v1, %v326_v17  ;;  %v283_v42 = vld [vmem:[%s545_s7 + $0x30] sm:$0xff]  ;;  %v284_v48 = vld [vmem:[%s545_s7 + $0x38] sm:$0xff] }
  0x13   : > { %v353_v20 = vadd.f32 %v561_v3, %v338_v8  ;;  %v316_v30 = vmax.f32 %v308_v21, 0.0  ;;  %v310_v31 = vadd.f32 %v556_v2, %v295_v22  ;;  %v296_v32 = vmul.f32 %v534_v0, %v281_v18  ;;  %v329_v47 = vld [vmem:[%s551_s10 + $0x30] sm:$0xff]  ;;  %v330_v53 = vld [vmem:[%s551_s10 + $0x38] sm:$0xff] }
  0x14   : > { %v315_v29 = vmax.f32 %v307_v19, 0.0  ;;  %v317_v34 = vmax.f32 %v309_v26, 0.0  ;;  %v356_v35 = vadd.f32 %v561_v3, %v341_v28  ;;  %v342_v36 = vmul.f32 %v539_v1, %v327_v23 }
  0x15   : > { %v297_v37 = vmul.f32 %v534_v0, %v282_v24  ;;  %v362_v39 = vadd.f32 %v354_v25, %v316_v30  ;;  %v318_v40 = vmax.f32 %v310_v31, 0.0  ;;  %v311_v41 = vadd.f32 %v556_v2, %v296_v32 }
  0x16   : > { %v361_v38 = vadd.f32 %v353_v20, %v315_v29  ;;  %v363_v43 = vadd.f32 %v355_v27, %v317_v34  ;;  %v357_v44 = vadd.f32 %v561_v3, %v342_v36  ;;  %v343_v46 = vmul.f32 %v539_v1, %v328_v33 }
  0x17   : > { %v312_v45 = vadd.f32 %v556_v2, %v297_v37  ;;  %v370_v50 = vmax.f32 %v362_v39, 0.0  ;;  %v364_v51 = vadd.f32 %v356_v35, %v318_v40  ;;  %v319_v52 = vmax.f32 %v311_v41, 0.0 }
  0x18   : > { %v369_v49 = vmax.f32 %v361_v38, 0.0  ;;  %v371_v54 = vmax.f32 %v363_v43, 0.0  ;;  %v358_v56 = vadd.f32 %v561_v3, %v343_v46  ;;  %v298_v57 = vmul.f32 %v534_v0, %v283_v42 }
  0x19   : > { %v320_v55 = vmax.f32 %v312_v45, 0.0  ;;  %378 = vst [vmem:[%s600_s17 + $0x8] sm:$0xff] %v370_v50  ;;  %v372_v58 = vmax.f32 %v364_v51, 0.0  ;;  %v365_v59 = vadd.f32 %v357_v44, %v319_v52  ;;  %v344_v60 = vmul.f32 %v539_v1, %v329_v47 }
  0x1a   : > { %377 = vst [vmem:[%s600_s17] sm:$0xff] %v369_v49  ;;  %v299_v61 = vmul.f32 %v534_v0, %v284_v48  ;;  %379 = vst [vmem:[%s600_s17 + $0x10] sm:$0xff] %v371_v54  ;;  %v313_v63 = vadd.f32 %v556_v2, %v298_v57  ;;  %v345_v4 = vmul.f32 %v539_v1, %v330_v53 }
  0x1b   : > { %v366_v62 = vadd.f32 %v358_v56, %v320_v55  ;;  %380 = vst [vmem:[%s600_s17 + $0x18] sm:$0xff] %v372_v58  ;;  %v373_v5 = vmax.f32 %v365_v59, 0.0  ;;  %v359_v6 = vadd.f32 %v561_v3, %v344_v60 }
  0x1c   : > { %v314_v7 = vadd.f32 %v556_v2, %v299_v61  ;;  %v321_v9 = vmax.f32 %v313_v63, 0.0  ;;  %v360_v10 = vadd.f32 %v561_v3, %v345_v4 }
  0x1d   : > { %v374_v8 = vmax.f32 %v366_v62, 0.0  ;;  %381 = vst [vmem:[%s600_s17 + $0x20] sm:$0xff] %v373_v5 }
  0x1e   : > { %v322_v0 = vmax.f32 %v314_v7, 0.0  ;;  %v367_v11 = vadd.f32 %v359_v6, %v321_v9 }
  0x1f   : > { %382 = vst [vmem:[%s600_s17 + $0x28] sm:$0xff] %v374_v8 }
  0x20   : > { %v368_v12 = vadd.f32 %v360_v10, %v322_v0  ;;  %v375_v13 = vmax.f32 %v367_v11, 0.0 }
  0x22   : > { %v376_v14 = vmax.f32 %v368_v12, 0.0  ;;  %383 = vst [vmem:[%s600_s17 + $0x30] sm:$0xff] %v375_v13 }
  0x24   : > { %384 = vst [vmem:[%s600_s17 + $0x38] sm:$0xff] %v376_v14 }
  0x25 PF: > { %s16_s21 = sadd.s32 1, %s484_s21  }
  0x26   : > { %p13_p4 = scmp.ge.s32.totalorder %s16_s21, 4  }
  0x28   :  { %15 = sbr.rel (!%p13_p4) target bundleno = 1 (0x1), region = 77 }

</bundles_post_ra>
